<compile_context>
chip_gen: v7x
topology: tpu7x:2x2x1
jax: 0.10.0
libtpu: 0.0.40
codegen_flags: <defaults>
</compile_context>

<pallas_src>
import jax
import jax.numpy as jnp
from jax.experimental import pallas as pl
from jax.experimental.pallas import tpu as pltpu

IN_DIM = 784
HID_DIM = 30
HID_PAD = 32   # 30 padded to 32 (sublane-aligned K for the second matmul)
OUT_DIM = 10


def _round_up(n, m):
    return ((n + m - 1) // m) * m


def _mlp_kernel(x_ref, w1_ref, b1_ref, w2_ref, b2_ref, o_ref):
    # Layer 1: [tb,784] @ [784,32] on the MXU, bf16 inputs + f32 accumulation.
    xb = x_ref[...].astype(jnp.bfloat16)    # no-op cast when x is already bf16
    w1b = w1_ref[...].astype(jnp.bfloat16)  # no-op cast when w1 is already bf16
    h = jnp.dot(xb, w1b, preferred_element_type=jnp.float32)
    h = jax.nn.sigmoid(h + b1_ref[...])
    # Layer 2: [tb,32] @ [32,10] + [1,10] -> sigmoid (tiny; kept f32).
    y = jnp.dot(h, w2_ref[...], preferred_element_type=jnp.float32)
    o_ref[...] = jax.nn.sigmoid(y + b2_ref[...]).astype(o_ref.dtype)


def feedforward_net(x, w1, b1, w2, b2, *, tb_max=4096):
    """x: [B, 784] (bf16 preferred, f32 accepted); padded params:
    w1 [784,32] (bf16 preferred), b1 [1,32] f32, w2 [32,10] f32, b2 [1,10] f32.

    Returns [B, 10] f32 sigmoid outputs (same forward math as the PyTorch module,
    with bf16 inputs to the first matmul and f32 accumulation).
    """
    B = x.shape[0]
    if B <= 16:
        tb = B                 # single full-extent block: always layout-legal
    else:
        # >= 2 grid steps so v7x's two TensorCores both get tiles; multiple of
        # 16 so bf16 sublane packing stays aligned. Ragged last tile is masked.
        tb = min(tb_max, _round_up(pl.cdiv(B, 2), 16))
    grid = (pl.cdiv(B, tb),)

    bytes_accessed = (
        B * IN_DIM * x.dtype.itemsize          # x stream (read)
        + B * OUT_DIM * 4                       # output (write)
        + IN_DIM * HID_PAD * w1.dtype.itemsize  # params (read once)
        + HID_PAD * 4 + HID_PAD * OUT_DIM * 4 + OUT_DIM * 4
    )
    cost = pl.CostEstimate(
        flops=2 * B * (IN_DIM * HID_PAD + HID_PAD * OUT_DIM),
        transcendentals=B * (HID_PAD + OUT_DIM),
        bytes_accessed=bytes_accessed,
    )

    return pl.pallas_call(
        _mlp_kernel,
        out_shape=jax.ShapeDtypeStruct((B, OUT_DIM), jnp.float32),
        grid=grid,
        in_specs=[
            # x: streamed per batch tile (double-buffered by the pipeline)
            pl.BlockSpec((tb, IN_DIM), lambda i: (i, 0)),
            # weights/biases: constant block index -> stay VMEM-resident
            pl.BlockSpec((IN_DIM, HID_PAD), lambda i: (0, 0)),
            pl.BlockSpec((1, HID_PAD), lambda i: (0, 0)),
            pl.BlockSpec((HID_PAD, OUT_DIM), lambda i: (0, 0)),
            pl.BlockSpec((1, OUT_DIM), lambda i: (0, 0)),
        ],
        out_specs=pl.BlockSpec((tb, OUT_DIM), lambda i: (i, 0)),
        compiler_params=pltpu.CompilerParams(
            dimension_semantics=("parallel",),
            vmem_limit_bytes=48 << 20,   # explicit, safe on v7x's 64 MiB VMEM
        ),
        cost_estimate=cost,
    )(x, w1, b1, w2, b2)


def init_params(key):
    """nn.Linear-style init (uniform(-1/sqrt(fan_in), +)) at the true 30/10 dims."""
    k1, k2, k3, k4 = jax.random.split(key, 4)
    bound1 = 1.0 / jnp.sqrt(jnp.float32(IN_DIM))
    bound2 = 1.0 / jnp.sqrt(jnp.float32(HID_DIM))
    w1 = jax.random.uniform(k1, (IN_DIM, HID_DIM), jnp.float32, -bound1, bound1)
    b1 = jax.random.uniform(k2, (1, HID_DIM), jnp.float32, -bound1, bound1)
    w2 = jax.random.uniform(k3, (HID_DIM, OUT_DIM), jnp.float32, -bound2, bound2)
    b2 = jax.random.uniform(k4, (1, OUT_DIM), jnp.float32, -bound2, bound2)
    return w1, b1, w2, b2


def pad_params(w1, b1, w2, b2):
    """Zero-pad hidden dim 30 -> 32 (exact math) and cast w1 to bf16 once."""
    pad = HID_PAD - HID_DIM
    w1p = jnp.pad(w1, ((0, 0), (0, pad))).astype(jnp.bfloat16)
    b1p = jnp.pad(b1, ((0, 0), (0, pad)))
    w2p = jnp.pad(w2, ((0, pad), (0, 0)))
    return w1p, b1p, w2p, b2


if __name__ == "__main__":
    key = jax.random.PRNGKey(0)
    kx, kp = jax.random.split(key)

    batch = 384  # small demo batch; tb=192 -> 2-step grid (exercises TC split)
    x_f32 = jax.random.normal(kx, (batch, IN_DIM), jnp.float32)
    x = x_f32.astype(jnp.bfloat16)          # stream x in bf16 (half the bytes)

    w1, b1, w2, b2 = init_params(kp)
    w1p, b1p, w2p, b2p = pad_params(w1, b1, w2, b2)

    out = feedforward_net(x, w1p, b1p, w2p, b2p)
    out = jax.block_until_ready(out)

    # Reference in plain JAX on the UNPADDED f32 parameters (PyTorch math),
    # fed the same bf16-quantized input. Tolerance relaxed for the bf16 path.
    ref = jax.nn.sigmoid(
        jax.nn.sigmoid(x.astype(jnp.float32) @ w1 + b1) @ w2 + b2)
    assert out.shape == (batch, OUT_DIM)
    assert jnp.allclose(out, ref, atol=1e-2, rtol=1e-2), float(
        jnp.max(jnp.abs(out - ref)))

    print("KERNEL_OK")
</pallas_src>

<mosaic_0001>
module attributes {stable_mosaic.version = 11 : i64} {
  func.func @_mlp_kernel(%arg0: i32, %arg1: memref<192x784xbf16, #tpu.memory_space<vmem>>, %arg2: memref<784x32xbf16, #tpu.memory_space<vmem>>, %arg3: memref<1x32xf32, #tpu.memory_space<vmem>>, %arg4: memref<32x10xf32, #tpu.memory_space<vmem>>, %arg5: memref<1x10xf32, #tpu.memory_space<vmem>>, %arg6: memref<192x10xf32, #tpu.memory_space<vmem>>) attributes {dimension_semantics = [#tpu.dimension_semantics<parallel>], iteration_bounds = array<i64: 2>, scalar_prefetch = 0 : i64, scratch_operands = 0 : i64, tpu.core_type = #tpu.core_type<tc>, window_params = [{transform_indices = @transform_0, window_bounds = array<i64: 192, 784>}, {pipeline_mode = #tpu.pipeline_mode<synchronous>, transform_indices = @transform_1, window_bounds = array<i64: 784, 32>}, {pipeline_mode = #tpu.pipeline_mode<synchronous>, transform_indices = @transform_2, window_bounds = array<i64: 1, 32>}, {pipeline_mode = #tpu.pipeline_mode<synchronous>, transform_indices = @transform_3, window_bounds = array<i64: 32, 10>}, {pipeline_mode = #tpu.pipeline_mode<synchronous>, transform_indices = @transform_4, window_bounds = array<i64: 1, 10>}, {transform_indices = @transform_5, window_bounds = array<i64: 192, 10>}]} {
    %c0 = arith.constant 0 : index
    %c0_0 = arith.constant 0 : index
    %0 = vector.load %arg1[%c0, %c0_0] : memref<192x784xbf16, #tpu.memory_space<vmem>>, vector<192x784xbf16>
    %c0_1 = arith.constant 0 : index
    %c0_2 = arith.constant 0 : index
    %1 = vector.load %arg2[%c0_1, %c0_2] : memref<784x32xbf16, #tpu.memory_space<vmem>>, vector<784x32xbf16>
    %cst = arith.constant dense<0.000000e+00> : vector<192x32xf32>
    %2 = tpu.matmul %0, %1, %cst {dimension_numbers = #tpu.dot_dimension_numbers<[1], [0], [0], [1], [0, 0, 1, 1], [], []>} : vector<192x784xbf16>, vector<784x32xbf16>, vector<192x32xf32> -> vector<192x32xf32>
    %c0_3 = arith.constant 0 : index
    %c0_4 = arith.constant 0 : index
    %3 = vector.load %arg3[%c0_3, %c0_4] : memref<1x32xf32, #tpu.memory_space<vmem>>, vector<1x32xf32>
    %4 = vector.broadcast %3 : vector<1x32xf32> to vector<192x32xf32>
    %5 = arith.addf %2, %4 : vector<192x32xf32>
    %6 = arith.negf %5 : vector<192x32xf32>
    %7 = math.exp %6 : vector<192x32xf32>
    %cst_5 = arith.constant 1.000000e+00 : f32
    %8 = vector.broadcast %cst_5 : f32 to vector<192x32xf32>
    %9 = arith.addf %8, %7 : vector<192x32xf32>
    %10 = arith.divf %8, %9 : vector<192x32xf32>
    %c0_6 = arith.constant 0 : index
    %c0_7 = arith.constant 0 : index
    %11 = vector.load %arg4[%c0_6, %c0_7] : memref<32x10xf32, #tpu.memory_space<vmem>>, vector<32x10xf32>
    %cst_8 = arith.constant dense<0.000000e+00> : vector<192x10xf32>
    %12 = tpu.matmul %10, %11, %cst_8 {dimension_numbers = #tpu.dot_dimension_numbers<[1], [0], [0], [1], [0, 0, 1, 1], [], []>} : vector<192x32xf32>, vector<32x10xf32>, vector<192x10xf32> -> vector<192x10xf32>
    %c0_9 = arith.constant 0 : index
    %c0_10 = arith.constant 0 : index
    %13 = vector.load %arg5[%c0_9, %c0_10] : memref<1x10xf32, #tpu.memory_space<vmem>>, vector<1x10xf32>
    %14 = vector.broadcast %13 : vector<1x10xf32> to vector<192x10xf32>
    %15 = arith.addf %12, %14 : vector<192x10xf32>
    %16 = arith.negf %15 : vector<192x10xf32>
    %17 = math.exp %16 : vector<192x10xf32>
    %cst_11 = arith.constant 1.000000e+00 : f32
    %18 = vector.broadcast %cst_11 : f32 to vector<192x10xf32>
    %19 = arith.addf %18, %17 : vector<192x10xf32>
    %20 = arith.divf %18, %19 : vector<192x10xf32>
    %c0_12 = arith.constant 0 : index
    %c0_13 = arith.constant 0 : index
    %21 = vector.load %arg6[%c0_12, %c0_13] : memref<192x10xf32, #tpu.memory_space<vmem>>, vector<192x10xf32>
    tpu.vector_store %arg6[%c0_12, %c0_13], %20 {strides = array<i32>} : memref<192x10xf32, #tpu.memory_space<vmem>>, vector<192x10xf32>,
    return
  }
  func.func @transform_0(%arg0: i32) -> (i32, i32) {
    %c0_i32 = arith.constant 0 : i32
    %c0_i32_0 = arith.constant 0 : i32
    return %arg0, %c0_i32 : i32, i32
  }
  func.func @transform_1(%arg0: i32) -> (i32, i32) {
    %c0_i32 = arith.constant 0 : i32
    %c0_i32_0 = arith.constant 0 : i32
    %c0_i32_1 = arith.constant 0 : i32
    return %c0_i32, %c0_i32_0 : i32, i32
  }
  func.func @transform_2(%arg0: i32) -> (i32, i32) {
    %c0_i32 = arith.constant 0 : i32
    %c0_i32_0 = arith.constant 0 : i32
    %c0_i32_1 = arith.constant 0 : i32
    return %c0_i32, %c0_i32_0 : i32, i32
  }
  func.func @transform_3(%arg0: i32) -> (i32, i32) {
    %c0_i32 = arith.constant 0 : i32
    %c0_i32_0 = arith.constant 0 : i32
    %c0_i32_1 = arith.constant 0 : i32
    return %c0_i32, %c0_i32_0 : i32, i32
  }
  func.func @transform_4(%arg0: i32) -> (i32, i32) {
    %c0_i32 = arith.constant 0 : i32
    %c0_i32_0 = arith.constant 0 : i32
    %c0_i32_1 = arith.constant 0 : i32
    return %c0_i32, %c0_i32_0 : i32, i32
  }
  func.func @transform_5(%arg0: i32) -> (i32, i32) {
    %c0_i32 = arith.constant 0 : i32
    %c0_i32_0 = arith.constant 0 : i32
    return %arg0, %c0_i32 : i32, i32
  }
}

</mosaic_0001>

<bundles_post_ra>
// kernel: tpu_custom_call.1
= control target key start
LH: loop header
LB: loop body
LE: loop exit
PB: predicated region body
PF: predicated region fallthrough
CT: control target
= control target key end

     0   :  { %s3357_s18 = smov 0   ;;  %s3881_s0 = inlined_call_operand.vmem [shape: bf16[384,784], index: 0, kind: input, shape index: {}]   ;;  %s3882_s1 = inlined_call_operand.vmem [shape: bf16[784,32], index: 1, kind: input, shape index: {}]   ;;  %s3883_s2 = inlined_call_operand.vmem [shape: f32[1,32], index: 2, kind: input, shape index: {}]   ;;  %s3884_s3 = inlined_call_operand.vmem [shape: f32[32,10], index: 3, kind: input, shape index: {}]   ;;  %s3885_s4 = inlined_call_operand.vmem [shape: f32[1,10], index: 4, kind: input, shape index: {}]   ;;  %s3886_s5 = inlined_call_operand.vmem [shape: f32[384,10], index: 5, kind: output, shape index: {}]  }
   0x1 LB: > { %s2338_s19 = sadd.s32 4294967295, %s3325_s18   ;;  %p2342_p0 = scmp.ge.s32.totalorder %s3325_s18, 1  ;;  %s3325_s18 = sphi %s3357_s18, %s15_s18  }
   0x2   : > { %p189_p1 = scmp.lt.s32.totalorder %s3325_s18, 3 }
   0x4   : > { %p190_p2 = pnand %p2342_p0, %p189_p1 }
   0x5   : > { %v2958_v0 = vld [vmem:[%s3882_s1 + $0x40] sm:$0xff] (!%p190_p2)   ;;  %v2962_v4 = vld [vmem:[%s3882_s1 + $0x48] sm:$0xff] (!%p190_p2)   ;;  %v2966_v8 = vld [vmem:[%s3882_s1 + $0x50] sm:$0xff] (!%p190_p2)   ;;  %s218_s23 = smul.u32 (!%p190_p2), 24, %s2338_s19  ;;  %vm1147_vm0 = vcmask (!%p190_p2), 130048   ;;  %vm1855_vm1 = vcmask (!%p190_p2), 261120  }
   0x6   : > { %193 = sbr.rel (%p190_p2) target bundleno = 711 (0x2c7), region = 40  ;;  %v2959_v1 = vld [vmem:[%s3882_s1] sm:$0xff] (!%p190_p2)   ;;  %2566 = vmatprep.subr.bf16.mxu0 (!%p190_p2), %v2958_v0  ;;  %v2963_v5 = vld [vmem:[%s3882_s1 + $0x8] sm:$0xff] (!%p190_p2)   ;;  %v2967_v9 = vld [vmem:[%s3882_s1 + $0x10] sm:$0xff] (!%p190_p2)   ;;  %vm2257_vm2 = vcmask (!%p190_p2), 80896  }
   0x7   : > { %v2960_v2 = vld [vmem:[%s3882_s1 + $0xc0] sm:$0xff] (!%p190_p2)   ;;  %2567 = vmatpush3.bf16.msra.mxu0 (!%p190_p2), %v2959_v1  ;;  %v2964_v6 = vld [vmem:[%s3882_s1 + $0xc8] sm:$0xff] (!%p190_p2)   ;;  %v2968_v10 = vld [vmem:[%s3882_s1 + $0xd0] sm:$0xff] (!%p190_p2)   ;;  %p219_p3 = scmp.lt.s32.totalorder (!%p190_p2), %s218_s23, 47 }
   0x8   : > { %v2961_v3 = vld [vmem:[%s3882_s1 + $0x80] sm:$0xff] (!%p190_p2)   ;;  %2654 = vmatprep.subr.bf16.mxu1 (!%p190_p2), %v2960_v2  ;;  %2568 = vmatprep.subr.bf16.mxu0 (!%p190_p2), %v2962_v4  ;;  %v2965_v7 = vld [vmem:[%s3882_s1 + $0x88] sm:$0xff] (!%p190_p2)   ;;  %v2969_v11 = vld [vmem:[%s3882_s1 + $0x90] sm:$0xff] (!%p190_p2)  }
   0x9   : > { %2655 = vmatpush3.bf16.msra.mxu1 (!%p190_p2), %v2961_v3  ;;  %v2970_v12 = vld [vmem:[%s3882_s1 + $0x58] sm:$0xff] (!%p190_p2)   ;;  %v2974_v16 = vld [vmem:[%s3882_s1 + $0x60] sm:$0xff] (!%p190_p2)   ;;  %v2978_v20 = vld [vmem:[%s3882_s1 + $0x68] sm:$0xff] (!%p190_p2)  }
   0xa   : > { %2656 = vmatprep.subr.bf16.mxu1 (!%p190_p2), %v2964_v6  ;;  %v2971_v13 = vld [vmem:[%s3882_s1 + $0x18] sm:$0xff] (!%p190_p2)   ;;  %v2975_v17 = vld [vmem:[%s3882_s1 + $0x20] sm:$0xff] (!%p190_p2)   ;;  %v2979_v21 = vld [vmem:[%s3882_s1 + $0x28] sm:$0xff] (!%p190_p2)  }
   0xb   : > { %2569 = vmatpush3.bf16.msra.mxu0 (!%p190_p2), %v2963_v5  ;;  %v2972_v14 = vld [vmem:[%s3882_s1 + $0xd8] sm:$0xff] (!%p190_p2)   ;;  %v2976_v18 = vld [vmem:[%s3882_s1 + $0xe0] sm:$0xff] (!%p190_p2)   ;;  %v2980_v22 = vld [vmem:[%s3882_s1 + $0xe8] sm:$0xff] (!%p190_p2)  }
   0xc   : > { %2570 = vmatprep.subr.bf16.mxu0 (!%p190_p2), %v2966_v8  ;;  %v2973_v15 = vld [vmem:[%s3882_s1 + $0x98] sm:$0xff] (!%p190_p2)   ;;  %v2977_v19 = vld [vmem:[%s3882_s1 + $0xa0] sm:$0xff] (!%p190_p2)   ;;  %v2981_v23 = vld [vmem:[%s3882_s1 + $0xa8] sm:$0xff] (!%p190_p2)  }
   0xd   : > { %2657 = vmatpush3.bf16.msra.mxu1 %v2965_v7  ;;  %s3888_s23 = smov (!%p219_p3, %s218_s23), 47  ;;  %v2982_v24 = vld [vmem:[%s3882_s1 + $0x70] sm:$0xff]   ;;  %v2986_v28 = vld [vmem:[%s3882_s1 + $0x78] sm:$0xff]   ;;  %v2993_v34 = vld [vmem:[%s3882_s1 + $0x140] sm:$0xff]  }
   0xe   : > { %2658 = vmatprep.subr.bf16.mxu1 %v2968_v10  ;;  %s2949_s25 = smul.u32 28, %s3888_s23  ;;  %v2983_v25 = vld [vmem:[%s3882_s1 + $0x30] sm:$0xff]   ;;  %v2987_v29 = vld [vmem:[%s3882_s1 + $0x38] sm:$0xff]   ;;  %v2997_v37 = vld [vmem:[%s3882_s1 + $0x100] sm:$0xff]   ;;  %s2344_s20 = sshll.u32 %s3888_s23, 3 }
   0xf   : > { %2571 = vmatpush3.bf16.msra.mxu0 %v2967_v9  ;;  %v2984_v26 = vld [vmem:[%s3882_s1 + $0xf0] sm:$0xff]   ;;  %v2988_v30 = vld [vmem:[%s3882_s1 + $0xf8] sm:$0xff]   ;;  %v3004_v41 = vld [vmem:[%s3882_s1 + $0x148] sm:$0xff]   ;;  %s3811_s24 = scalar_lea.vmem %s3886_s5, %s2344_s20 }
  0x10   : > { %2572 = vmatprep.subr.bf16.mxu0 %v2970_v12  ;;  %v2985_v27 = vld [vmem:[%s3882_s1 + $0xb0] sm:$0xff]   ;;  %s3458_s10 = scalar_lea.vmem %s3881_s0, %s2949_s25  ;;  %v2992_v33 = vld [vmem:[%s3882_s1 + $0xb8] sm:$0xff]   ;;  %v3005_v42 = vld [vmem:[%s3882_s1 + $0x108] sm:$0xff]  }
  0x11   : > { %2659 = vmatpush3.bf16.msra.mxu1 %v2969_v11  ;;  %v2989_v31 = vld [vmem:[%s3458_s10] ss:$28 sps:$4 sm:$0xff]   ;;  %v2994_v35 = vld [vmem:[%s3458_s10 + $0x8] ss:$28 sps:$4 sm:$0xff]   ;;  %v3000_v40 = vld [vmem:[%s3458_s10 + $0x38] ss:$28 sps:$4 sm:$0xff]  }
  0x12   : > { %2660 = vmatprep.subr.bf16.mxu1 %v2972_v14  ;;  %v2991_v32 = vld [vmem:[%s3458_s10 + $0x4] ss:$28 sps:$4 sm:$0xff]   ;;  %v2996_v36 = vld [vmem:[%s3458_s10 + $0xc] ss:$28 sps:$4 sm:$0xff]   ;;  %v2998_v38 = vld [vmem:[%s3458_s10 + $0x3c] ss:$28 sps:$4 sm:$0xff]  }
  0x13   : > { %2573 = vmatpush3.bf16.msra.mxu0 %v2971_v13  ;;  %1216 = vmatprep.mubr.bf16.mxu0 %v2991_v32  ;;  %v3001_v39 = vld [vmem:[%s3458_s10 + $0x44] ss:$28 sps:$4 sm:$0xff]   ;;  %v3006_v44 = vld [vmem:[%s3458_s10 + $0x74] ss:$28 sps:$4 sm:$0xff]   ;;  %v3009_v45 = vld [vmem:[%s3458_s10 + $0x7c] ss:$28 sps:$4 sm:$0xff]  }
  0x14   : > { %2574 = vmatprep.subr.bf16.mxu0 %v2974_v16  ;;  %1345 = vmatprep.mubr.bf16.mxu1 %v2996_v36  ;;  %v3003_v43 = vld [vmem:[%s3458_s10 + $0x40] ss:$28 sps:$4 sm:$0xff]   ;;  %v3015_v46 = vld [vmem:[%s3882_s1 + $0x150] sm:$0xff]   ;;  %v3012_v48 = vld [vmem:[%s3458_s10 + $0xac] ss:$28 sps:$4 sm:$0xff]  }
  0x15   : > { %2661 = vmatpush3.bf16.msra.mxu1 %v2973_v15  ;;  %v3008_v47 = vld [vmem:[%s3458_s10 + $0x70] ss:$28 sps:$4 sm:$0xff]   ;;  %v3011_v50 = vld [vmem:[%s3458_s10 + $0x78] ss:$28 sps:$4 sm:$0xff]   ;;  %v3014_v54 = vld [vmem:[%s3458_s10 + $0xa8] ss:$28 sps:$4 sm:$0xff]  }
  0x16   : > { %2662 = vmatprep.subr.bf16.mxu1 %v2976_v18  ;;  %v3018_v49 = vld [vmem:[%s3882_s1 + $0x110] sm:$0xff]   ;;  %v3026_v52 = vld [vmem:[%s3882_s1 + $0x158] sm:$0xff]   ;;  %v3020_v56 = vld [vmem:[%s3458_s10 + $0xe4] ss:$28 sps:$4 sm:$0xff]  }
  0x17   : > { %2575 = vmatpush3.bf16.msra.mxu0 %v2975_v17  ;;  %v3016_v51 = vld [vmem:[%s3458_s10 + $0xb4] ss:$28 sps:$4 sm:$0xff]   ;;  %v3027_v53 = vld [vmem:[%s3882_s1 + $0x118] sm:$0xff]   ;;  %v3023_v57 = vld [vmem:[%s3458_s10 + $0xec] ss:$28 sps:$4 sm:$0xff]  }
  0x18   : > { %2576 = vmatprep.subr.bf16.mxu0 %v2978_v20  ;;  %v3019_v55 = vld [vmem:[%s3458_s10 + $0xb0] ss:$28 sps:$4 sm:$0xff]   ;;  %v3037_v58 = vld [vmem:[%s3882_s1 + $0x160] sm:$0xff]   ;;  %v3028_v63 = vld [vmem:[%s3458_s10 + $0x11c] ss:$28 sps:$4 sm:$0xff]  }
  0x19   : > { %2663 = vmatpush3.bf16.msra.mxu1 %v2977_v19  ;;  %v3038_v59 = vld [vmem:[%s3882_s1 + $0x180] sm:$0xff]   ;;  %v3049_v0 = vld [vmem:[%s3882_s1 + $0x168] sm:$0xff]   ;;  %v3030_v3 = vld [vmem:[%s3458_s10 + $0x118] ss:$28 sps:$4 sm:$0xff]  }
  0x1a   : > { %2664 = vmatprep.subr.bf16.mxu1 %v2980_v22  ;;  %v3041_v60 = vld [vmem:[%s3882_s1 + $0x120] sm:$0xff]   ;;  %v3050_v1 = vld [vmem:[%s3882_s1 + $0x128] sm:$0xff]   ;;  %v3060_v4 = vld [vmem:[%s3882_s1 + $0x170] sm:$0xff]  }
  0x1b   : > { %2577 = vmatpush3.bf16.msra.mxu0 %v2979_v21  ;;  %v3022_v61 = vld [vmem:[%s3458_s10 + $0xe0] ss:$28 sps:$4 sm:$0xff]   ;;  %v3025_v62 = vld [vmem:[%s3458_s10 + $0xe8] ss:$28 sps:$4 sm:$0xff]   ;;  %v3034_v5 = vld [vmem:[%s3458_s10 + $0x154] ss:$28 sps:$4 sm:$0xff]  }
  0x1c   : > { %2578 = vmatprep.subr.bf16.mxu0 %v2982_v24  ;;  %v3031_v2 = vld [vmem:[%s3458_s10 + $0x124] ss:$28 sps:$4 sm:$0xff]   ;;  %v3063_v6 = vld [vmem:[%s3882_s1 + $0x130] sm:$0xff]   ;;  %v3039_v8 = vld [vmem:[%s3458_s10 + $0x15c] ss:$28 sps:$4 sm:$0xff]  }
  0x1d   : > { %2665 = vmatpush3.bf16.msra.mxu1 %v2981_v23  ;;  %v3033_v7 = vld [vmem:[%s3458_s10 + $0x120] ss:$28 sps:$4 sm:$0xff]   ;;  %v3036_v11 = vld [vmem:[%s3458_s10 + $0x150] ss:$28 sps:$4 sm:$0xff]   ;;  %v3042_v13 = vld [vmem:[%s3458_s10 + $0x158] ss:$28 sps:$4 sm:$0xff]  }
  0x1e   : > { %2666 = vmatprep.subr.bf16.mxu1 %v2984_v26  ;;  %v3071_v9 = vld [vmem:[%s3882_s1 + $0x178] sm:$0xff]   ;;  %v3043_v12 = vld [vmem:[%s3458_s10 + $0x18c] ss:$28 sps:$4 sm:$0xff]   ;;  %v3046_v14 = vld [vmem:[%s3458_s10 + $0x194] ss:$28 sps:$4 sm:$0xff]  }
  0x1f   : > { %2579 = vmatpush3.bf16.msra.mxu0 %v2983_v25  ;;  %v3072_v10 = vld [vmem:[%s3882_s1 + $0x138] sm:$0xff]   ;;  %v3045_v15 = vld [vmem:[%s3458_s10 + $0x188] ss:$28 sps:$4 sm:$0xff]   ;;  %v3048_v17 = vld [vmem:[%s3458_s10 + $0x190] ss:$28 sps:$4 sm:$0xff]  }
  0x20   : > { %2580 = vmatprep.subr.bf16.mxu0 %v2986_v28  ;;  %v3051_v16 = vld [vmem:[%s3458_s10 + $0x1c4] ss:$28 sps:$4 sm:$0xff]   ;;  %v3054_v18 = vld [vmem:[%s3458_s10 + $0x1cc] ss:$28 sps:$4 sm:$0xff]   ;;  %v3057_v20 = vld [vmem:[%s3458_s10 + $0x1fc] ss:$28 sps:$4 sm:$0xff]  }
  0x21   : > { %2667 = vmatpush3.bf16.msra.mxu1 %v2985_v27  ;;  %v3053_v19 = vld [vmem:[%s3458_s10 + $0x1c0] ss:$28 sps:$4 sm:$0xff]   ;;  %v3056_v21 = vld [vmem:[%s3458_s10 + $0x1c8] ss:$28 sps:$4 sm:$0xff]   ;;  %v3059_v23 = vld [vmem:[%s3458_s10 + $0x1f8] ss:$28 sps:$4 sm:$0xff]  }
  0x22   : > { %2668 = vmatprep.subr.bf16.mxu1 %v2988_v30  ;;  %v3061_v22 = vld [vmem:[%s3458_s10 + $0x204] ss:$28 sps:$4 sm:$0xff]   ;;  %v3065_v24 = vld [vmem:[%s3458_s10 + $0x234] ss:$28 sps:$4 sm:$0xff]   ;;  %v3068_v26 = vld [vmem:[%s3458_s10 + $0x23c] ss:$28 sps:$4 sm:$0xff]  }
  0x23   : > { %2581 = vmatpush3.bf16.msra.mxu0 %v2987_v29  ;;  %v3064_v25 = vld [vmem:[%s3458_s10 + $0x200] ss:$28 sps:$4 sm:$0xff]   ;;  %v3067_v27 = vld [vmem:[%s3458_s10 + $0x230] ss:$28 sps:$4 sm:$0xff]   ;;  %v3070_v29 = vld [vmem:[%s3458_s10 + $0x238] ss:$28 sps:$4 sm:$0xff]  }
  0x24   : > { %2742 = vmatprep.subr.bf16.mxu0 %v2993_v34  ;;  %v3073_v28 = vld [vmem:[%s3458_s10 + $0x26c] ss:$28 sps:$4 sm:$0xff]   ;;  %v3076_v30 = vld [vmem:[%s3458_s10 + $0x274] ss:$28 sps:$4 sm:$0xff]  }
  0x25   : > { %2669 = vmatpush3.bf16.msra.mxu1 %v2992_v33  ;;  %v3081_v32 = vld [vmem:[%s3458_s10 + $0x14] ss:$28 sps:$4 sm:$0xff]   ;;  %v3084_v36 = vld [vmem:[%s3458_s10 + $0x4c] ss:$28 sps:$4 sm:$0xff]  }
  0x26   : > { %1217 = vmatmul.mubr.bf16.vlgmr.msra.gmra.mrb[0].mxu0 %v2989_v31  ;;  %2871 = vmatprep.subr.bf16.mxu1 %v3038_v59  ;;  %v3075_v31 = vld [vmem:[%s3458_s10 + $0x268] ss:$28 sps:$4 sm:$0xff]   ;;  %v3078_v33 = vld [vmem:[%s3458_s10 + $0x270] ss:$28 sps:$4 sm:$0xff]   ;;  %v3082_v34 = vld [vmem:[%s3458_s10 + $0x18] ss:$28 sps:$4 sm:$0xff]  }
  0x27   : > { %2743 = vmatpush3.bf16.msra.mxu0 %v2997_v37  ;;  %1224 = vmatprep.mubr.bf16.mxu0 %v2998_v38  ;;  %v3083_v37 = vld [vmem:[%s3458_s10 + $0x50] ss:$28 sps:$4 sm:$0xff]   ;;  %v3090_v38 = vld [vmem:[%s3458_s10 + $0x88] ss:$28 sps:$4 sm:$0xff]  }
  0x28   : > { %1346 = vmatmul.mubr.bf16.vlgmr.msra.gmra.mrb[0].mxu1 %v2994_v35  ;;  %2744 = vmatprep.subr.bf16.mxu0 %v3004_v41  ;;  %v3079_v35 = vld [vmem:[%s3458_s10 + $0x10] ss:$28 sps:$4 sm:$0xff]   ;;  %v3091_v41 = vld [vmem:[%s3458_s10 + $0xc0] ss:$28 sps:$4 sm:$0xff]  }
  0x29   : > { %1353 = vmatprep.mubr.bf16.mxu1 %v3001_v39  ;;  %2872 = vmatpush3.bf16.msra.mxu1 %v3038_v59  ;;  %v3086_v39 = vld [vmem:[%s3458_s10 + $0x48] ss:$28 sps:$4 sm:$0xff]   ;;  %v3108_v59 = vld [vmem:[%s3458_s10 + $0x19c] ss:$28 sps:$4 sm:$0xff]  }
  0x2b   : > { %2745 = vmatpush3.bf16.msra.mxu0 %v3005_v42  ;;  %v3098_v42 = vld [vmem:[%s3458_s10 + $0xf8] ss:$28 sps:$4 sm:$0xff]  }
  0x2c   : > { %2746 = vmatprep.subr.bf16.mxu0 %v3015_v46  ;;  %v3106_v46 = vld [vmem:[%s3458_s10 + $0x168] ss:$28 sps:$4 sm:$0xff]  }
  0x2e   : > { %1225 = vmatmul.mubr.bf16.gmra.mrb[4].mxu0 %v3000_v40  ;;  %v3087_v40 = vld [vmem:[%s3458_s10 + $0x84] ss:$28 sps:$4 sm:$0xff]  }
  0x2f   : > { %1232 = vmatprep.mubr.bf16.mxu0 %v3006_v44  ;;  %2747 = vmatpush3.bf16.msra.mxu0 %v3018_v49  ;;  %v3092_v44 = vld [vmem:[%s3458_s10 + $0xbc] ss:$28 sps:$4 sm:$0xff]  }
  0x30   : > { %1354 = vmatmul.mubr.bf16.gmra.mrb[4].mxu1 %v3003_v43  ;;  %2748 = vmatprep.subr.bf16.mxu0 %v3026_v52  ;;  %v3089_v43 = vld [vmem:[%s3458_s10 + $0x80] ss:$28 sps:$4 sm:$0xff]   ;;  %v3100_v52 = vld [vmem:[%s3458_s10 + $0x12c] ss:$28 sps:$4 sm:$0xff]  }
  0x31   : > { %1361 = vmatprep.mubr.bf16.mxu1 %v3009_v45  ;;  %v3099_v45 = vld [vmem:[%s3458_s10 + $0x130] ss:$28 sps:$4 sm:$0xff]   ;;  %v3107_v49 = vld [vmem:[%s3458_s10 + $0x1a0] ss:$28 sps:$4 sm:$0xff]  }
  0x33   : > { %2749 = vmatpush3.bf16.msra.mxu0 %v3027_v53  ;;  %v3115_v53 = vld [vmem:[%s3458_s10 + $0x210] ss:$28 sps:$4 sm:$0xff]  }
  0x34   : > { %2750 = vmatprep.subr.bf16.mxu0 %v3037_v58  ;;  %v3105_v58 = vld [vmem:[%s3458_s10 + $0x160] ss:$28 sps:$4 sm:$0xff]  }
  0x36   : > { %1233 = vmatmul.mubr.bf16.gmra.mrb[8].mxu0 %v3008_v47  ;;  %v3094_v47 = vld [vmem:[%s3458_s10 + $0xb8] ss:$28 sps:$4 sm:$0xff]  }
  0x37   : > { %1240 = vmatprep.mubr.bf16.mxu0 %v3012_v48  ;;  %2751 = vmatpush3.bf16.msra.mxu0 %v3041_v60  ;;  %v3095_v48 = vld [vmem:[%s3458_s10 + $0xf4] ss:$28 sps:$4 sm:$0xff]  }
  0x38   : > { %1362 = vmatmul.mubr.bf16.gmra.mrb[8].mxu1 %v3011_v50  ;;  %2752 = vmatprep.subr.bf16.mxu0 %v3049_v0  ;;  %v3114_v50 = vld [vmem:[%s3458_s10 + $0x1d8] ss:$28 sps:$4 sm:$0xff]   ;;  %v3118_v0 = vld [vmem:[%s3458_s10 + $0x208] ss:$28 sps:$4 sm:$0xff]  }
  0x39   : > { %1369 = vmatprep.mubr.bf16.mxu1 %v3016_v51  ;;  %v3097_v51 = vld [vmem:[%s3458_s10 + $0xf0] ss:$28 sps:$4 sm:$0xff]   ;;  %v3110_v60 = vld [vmem:[%s3458_s10 + $0x198] ss:$28 sps:$4 sm:$0xff]  }
  0x3b   : > { %2753 = vmatpush3.bf16.msra.mxu0 %v3050_v1  ;;  %v3119_v1 = vld [vmem:[%s3458_s10 + $0x244] ss:$28 sps:$4 sm:$0xff]  }
  0x3c   : > { %2754 = vmatprep.subr.bf16.mxu0 %v3060_v4  ;;  %v3126_v4 = vld [vmem:[%s3458_s10 + $0x278] ss:$28 sps:$4 sm:$0xff]  }
  0x3e   : > { %1241 = vmatmul.mubr.bf16.gmra.mrb[12].mxu0 %v3014_v54  ;;  %v3122_v54 = vld [vmem:[%s3458_s10 + $0x248] ss:$28 sps:$4 sm:$0xff]  }
  0x3f   : > { %1248 = vmatprep.mubr.bf16.mxu0 %v3020_v56  ;;  %2755 = vmatpush3.bf16.msra.mxu0 %v3063_v6  ;;  %v3103_v56 = vld [vmem:[%s3458_s10 + $0x164] ss:$28 sps:$4 sm:$0xff]   ;;  %v1845_v6 = vld [vmem:[%s3884_s3 + $0x8] sm:$0xff] }
  0x40   : > { %1370 = vmatmul.mubr.bf16.gmra.mrb[12].mxu1 %v3019_v55  ;;  %2756 = vmatprep.subr.bf16.mxu0 %v3071_v9  ;;  %v3102_v55 = vld [vmem:[%s3458_s10 + $0x128] ss:$28 sps:$4 sm:$0xff]   ;;  %v1847_v9 = vld [vmem:[%s3884_s3 + $0x18] sm:$0xff] }
  0x41   : > { %1377 = vmatprep.mubr.bf16.mxu1 %v3023_v57  ;;  %v3123_v57 = vld [vmem:[%s3458_s10 + $0x280] ss:$28 sps:$4 sm:$0xff]  }
  0x43   : > { %2757 = vmatpush3.bf16.msra.mxu0 %v3072_v10 }
  0x46   : > { %1249 = vmatmul.mubr.bf16.gmra.mrb[16].mxu0 %v3022_v61  ;;  %v3111_v61 = vld [vmem:[%s3458_s10 + $0x1d4] ss:$28 sps:$4 sm:$0xff]  }
  0x47   : > { %1256 = vmatprep.mubr.bf16.mxu0 %v3028_v63  ;;  %v3116_v63 = vld [vmem:[%s3458_s10 + $0x20c] ss:$28 sps:$4 sm:$0xff]  }
  0x48   : > { %1378 = vmatmul.mubr.bf16.gmra.mrb[16].mxu1 %v3025_v62  ;;  %v3113_v62 = vld [vmem:[%s3458_s10 + $0x1d0] ss:$28 sps:$4 sm:$0xff]  }
  0x49   : > { %1385 = vmatprep.mubr.bf16.mxu1 %v3031_v2  ;;  %v3121_v2 = vld [vmem:[%s3458_s10 + $0x240] ss:$28 sps:$4 sm:$0xff]  }
  0x4e   : > { %1257 = vmatmul.mubr.bf16.gmra.mrb[20].mxu0 %v3030_v3  ;;  %v3124_v3 = vld [vmem:[%s3458_s10 + $0x27c] ss:$28 sps:$4 sm:$0xff]  }
  0x4f   : > { %1264 = vmatprep.mubr.bf16.mxu0 %v3034_v5  ;;  %v1844_v5 = vld [vmem:[%s3884_s3] sm:$0xff] }
  0x50   : > { %1386 = vmatmul.mubr.bf16.gmra.mrb[20].mxu1 %v3033_v7  ;;  %v2941_v7 = vpack.c.bf16 %v1845_v6, %v1844_v5 }
  0x51   : > { %1393 = vmatprep.mubr.bf16.mxu1 %v3039_v8  ;;  %v1846_v8 = vld [vmem:[%s3884_s3 + $0x10] sm:$0xff] }
  0x52   : > { %2942 = vmatprep.subr.bf16.mxu1 %v2941_v7  ;;  %v2945_v10 = vpack.c.bf16 %v1847_v9, %v1846_v8 }
  0x56   : > { %1265 = vmatmul.mubr.bf16.gmra.mrb[24].mxu0 %v3036_v11 }
  0x57   : > { %1272 = vmatprep.mubr.bf16.mxu0 %v3043_v12  ;;  %v3631_v12 = vld [vmem:[%s3883_s2] ss:$0 sm:$0xff] }
  0x58   : > { %1394 = vmatmul.mubr.bf16.gmra.mrb[24].mxu1 %v3042_v13 }
  0x59   : > { %1401 = vmatprep.mubr.bf16.mxu1 %v3046_v14 }
  0x5e   : > { %1273 = vmatmul.mubr.bf16.gmra.mrb[28].mxu0 %v3045_v15 }
  0x5f   : > { %1280 = vmatprep.mubr.bf16.mxu0 %v3051_v16 }
  0x60   : > { %1402 = vmatmul.mubr.bf16.gmra.mrb[28].mxu1 %v3048_v17 }
  0x61   : > { %1409 = vmatprep.mubr.bf16.mxu1 %v3054_v18 }
  0x66   : > { %1281 = vmatmul.mubr.bf16.gmra.mrb[32].mxu0 %v3053_v19 }
  0x67   : > { %1288 = vmatprep.mubr.bf16.mxu0 %v3057_v20 }
  0x68   : > { %1410 = vmatmul.mubr.bf16.gmra.mrb[32].mxu1 %v3056_v21 }
  0x69   : > { %1417 = vmatprep.mubr.bf16.mxu1 %v3061_v22 }
  0x6e   : > { %1289 = vmatmul.mubr.bf16.gmra.mrb[36].mxu0 %v3059_v23 }
  0x6f   : > { %1296 = vmatprep.mubr.bf16.mxu0 %v3065_v24 }
  0x70   : > { %1418 = vmatmul.mubr.bf16.gmra.mrb[36].mxu1 %v3064_v25 }
  0x71   : > { %1425 = vmatprep.mubr.bf16.mxu1 %v3068_v26 }
  0x76   : > { %1297 = vmatmul.mubr.bf16.gmra.mrb[40].mxu0 %v3067_v27 }
  0x77   : > { %1304 = vmatprep.mubr.bf16.mxu0 %v3073_v28 }
  0x78   : > { %1426 = vmatmul.mubr.bf16.gmra.mrb[40].mxu1 %v3070_v29 }
  0x79   : > { %1433 = vmatprep.mubr.bf16.mxu1 %v3076_v30 }
  0x7e   : > { %1305 = vmatmul.mubr.bf16.gmra.mrb[44].mxu0 %v3075_v31 }
  0x7f   : > { %1474 = vmatprep.mubr.bf16.mxu0 %v3081_v32 }
  0x80   : > { %1434 = vmatmul.mubr.bf16.gmra.mrb[44].mxu1 %v3078_v33 }
  0x81   : > { %2873 = vmatprep.mubr.msk.bf16.mxu1 %vm1147_vm0, %v3082_v34 }
  0x86   : > { %1475 = vmatmul.mubr.bf16.vlgmr.msra.gmra.mrb[48].mxu0 %v3079_v35 }
  0x87   : > { %1482 = vmatprep.mubr.bf16.mxu0 %v3084_v36 }
  0x88   : > { %2874 = vmatmul.mubr.msk.bf16.vlgmr.msra.gmra.mrb[48].mxu1 %vm1147_vm0, %v3083_v37 }
  0x89   : > { %2877 = vmatprep.mubr.msk.bf16.mxu1 %vm1147_vm0, %v3090_v38  ;;  %2944 = vmatpush3.bf16.msra.mxu1 %v2941_v7 }
  0x8a   : > { %2946 = vmatprep.subr.bf16.mxu1 %v2945_v10 }
  0x8d   : > { %2948 = vmatpush3.bf16.msra.mxu1 %v2945_v10 }
  0x8e   : > { %1483 = vmatmul.mubr.bf16.gmra.mrb[52].mxu0 %v3086_v39 }
  0x8f   : > { %1490 = vmatprep.mubr.bf16.mxu0 %v3087_v40 }
  0x90   : > { %2878 = vmatmul.mubr.msk.bf16.gmra.mrb[52].mxu1 %vm1147_vm0, %v3091_v41 }
  0x91   : > { %2881 = vmatprep.mubr.msk.bf16.mxu1 %vm1147_vm0, %v3098_v42 }
  0x96   : > { %1491 = vmatmul.mubr.bf16.gmra.mrb[56].mxu0 %v3089_v43 }
  0x97   : > { %1498 = vmatprep.mubr.bf16.mxu0 %v3092_v44 }
  0x98   : > { %2882 = vmatmul.mubr.msk.bf16.gmra.mrb[56].mxu1 %vm1147_vm0, %v3099_v45 }
  0x99   : > { %2885 = vmatprep.mubr.msk.bf16.mxu1 %vm1147_vm0, %v3106_v46 }
  0x9e   : > { %1499 = vmatmul.mubr.bf16.gmra.mrb[60].mxu0 %v3094_v47 }
  0x9f   : > { %1506 = vmatprep.mubr.bf16.mxu0 %v3095_v48 }
  0xa0   : > { %2886 = vmatmul.mubr.msk.bf16.gmra.mrb[60].mxu1 %vm1147_vm0, %v3107_v49 }
  0xa1   : > { %2889 = vmatprep.mubr.msk.bf16.mxu1 %vm1147_vm0, %v3114_v50 }
  0xa6   : > { %1507 = vmatmul.mubr.bf16.gmra.mrb[64].mxu0 %v3097_v51 }
  0xa7   : > { %1514 = vmatprep.mubr.bf16.mxu0 %v3100_v52 }
  0xa8   : > { %2890 = vmatmul.mubr.msk.bf16.gmra.mrb[64].mxu1 %vm1147_vm0, %v3115_v53 }
  0xa9   : > { %2893 = vmatprep.mubr.msk.bf16.mxu1 %vm1147_vm0, %v3122_v54 }
  0xae   : > { %1515 = vmatmul.mubr.bf16.gmra.mrb[68].mxu0 %v3102_v55 }
  0xaf   : > { %1522 = vmatprep.mubr.bf16.mxu0 %v3103_v56 }
  0xb0   : > { %2894 = vmatmul.mubr.msk.bf16.gmra.mrb[68].mxu1 %vm1147_vm0, %v3123_v57 }
  0xb6   : > { %1523 = vmatmul.mubr.bf16.gmra.mrb[72].mxu0 %v3105_v58 }
  0xb7   : > { %1530 = vmatprep.mubr.bf16.mxu0 %v3108_v59 }
  0xbe   : > { %1531 = vmatmul.mubr.bf16.gmra.mrb[76].mxu0 %v3110_v60 }
  0xbf   : > { %1538 = vmatprep.mubr.bf16.mxu0 %v3111_v61 }
  0xc6   : > { %1539 = vmatmul.mubr.bf16.gmra.mrb[80].mxu0 %v3113_v62 }
  0xc7   : > { %1546 = vmatprep.mubr.bf16.mxu0 %v3116_v63 }
  0xce   : > { %1547 = vmatmul.mubr.bf16.gmra.mrb[84].mxu0 %v3118_v0 }
  0xcf   : > { %1554 = vmatprep.mubr.bf16.mxu0 %v3119_v1 }
  0xd6   : > { %1555 = vmatmul.mubr.bf16.gmra.mrb[88].mxu0 %v3121_v2 }
  0xd7   : > { %1562 = vmatprep.mubr.bf16.mxu0 %v3124_v3 }
  0xde   : > { %1563 = vmatmul.mubr.bf16.gmra.mrb[92].mxu0 %v3126_v4 }
  0xf9   : > { %v2582_v11 = vpop.f32.mrb[0].mxu0 }
  0xfa   : > { %v2583_v13 = vpop.f32.mrb[1].mxu0 }
  0xfb   : > { %v2584_v14 = vadd.f32 %v2583_v13, %v2582_v11  ;;  %v2585_v15 = vpop.f32.mrb[2].mxu0  ;;  %v2670_v16 = vpop.f32.mrb[0].mxu1 }
  0xfc   : > { %v2586_v17 = vpop.f32.mrb[3].mxu0  ;;  %v2671_v20 = vpop.f32.mrb[1].mxu1 }
  0xfd   : > { %v1219_v18 = vadd.f32 %v2584_v14, %v3631_v12  ;;  %v2587_v19 = vadd.f32 %v2586_v17, %v2585_v15  ;;  %v2672_v21 = vadd.f32 %v2671_v20, %v2670_v16  ;;  %v2673_v22 = vpop.f32.mrb[2].mxu1 }
  0xfe   : > { %v2674_v24 = vpop.f32.mrb[3].mxu1 }
  0xff   : > { %v1222_v23 = vadd.f32 %v2587_v19, %v3631_v12  ;;  %v3635_v25 = vadd.f32 %v2672_v21, %v1219_v18  ;;  %v2675_v26 = vadd.f32 %v2674_v24, %v2673_v22 }
 0x101   : > { %v2588_v27 = vpop.f32.mrb[4].mxu0  ;;  %v3637_v28 = vadd.f32 %v2675_v26, %v1222_v23 }
 0x102   : > { %v2589_v29 = vpop.f32.mrb[5].mxu0 }
 0x103   : > { %v2590_v30 = vadd.f32 %v2589_v29, %v2588_v27  ;;  %v2591_v31 = vpop.f32.mrb[6].mxu0  ;;  %v2676_v32 = vpop.f32.mrb[4].mxu1 }
 0x104   : > { %v2592_v33 = vpop.f32.mrb[7].mxu0  ;;  %v2677_v36 = vpop.f32.mrb[5].mxu1 }
 0x105   : > { %v1227_v34 = vadd.f32 %v2590_v30, %v3631_v12  ;;  %v2593_v35 = vadd.f32 %v2592_v33, %v2591_v31  ;;  %v2678_v37 = vadd.f32 %v2677_v36, %v2676_v32  ;;  %v2679_v38 = vpop.f32.mrb[6].mxu1 }
 0x106   : > { %v2680_v40 = vpop.f32.mrb[7].mxu1 }
 0x107   : > { %v1230_v39 = vadd.f32 %v2593_v35, %v3631_v12  ;;  %v3641_v41 = vadd.f32 %v2678_v37, %v1227_v34  ;;  %v2681_v42 = vadd.f32 %v2680_v40, %v2679_v38 }
 0x109   : > { %v2594_v43 = vpop.f32.mrb[8].mxu0  ;;  %v3643_v44 = vadd.f32 %v2681_v42, %v1230_v39 }
 0x10a   : > { %v2595_v45 = vpop.f32.mrb[9].mxu0 }
 0x10b   : > { %v2596_v46 = vadd.f32 %v2595_v45, %v2594_v43  ;;  %v2597_v47 = vpop.f32.mrb[10].mxu0  ;;  %v2682_v48 = vpop.f32.mrb[8].mxu1 }
 0x10c   : > { %v2598_v49 = vpop.f32.mrb[11].mxu0  ;;  %v2683_v52 = vpop.f32.mrb[9].mxu1 }
 0x10d   : > { %v1235_v50 = vadd.f32 %v2596_v46, %v3631_v12  ;;  %v2599_v51 = vadd.f32 %v2598_v49, %v2597_v47  ;;  %v2684_v53 = vadd.f32 %v2683_v52, %v2682_v48  ;;  %v2685_v54 = vpop.f32.mrb[10].mxu1 }
 0x10e   : > { %v2686_v56 = vpop.f32.mrb[11].mxu1 }
 0x10f   : > { %v1238_v55 = vadd.f32 %v2599_v51, %v3631_v12  ;;  %v3647_v57 = vadd.f32 %v2684_v53, %v1235_v50  ;;  %v2687_v58 = vadd.f32 %v2686_v56, %v2685_v54 }
 0x111   : > { %v2600_v59 = vpop.f32.mrb[12].mxu0  ;;  %v3649_v60 = vadd.f32 %v2687_v58, %v1238_v55 }
 0x112   : > { %v2601_v61 = vpop.f32.mrb[13].mxu0 }
 0x113   : > { %v2602_v62 = vadd.f32 %v2601_v61, %v2600_v59  ;;  %v2603_v63 = vpop.f32.mrb[14].mxu0  ;;  %v2688_v0 = vpop.f32.mrb[12].mxu1 }
 0x114   : > { %v2604_v1 = vpop.f32.mrb[15].mxu0  ;;  %v2689_v4 = vpop.f32.mrb[13].mxu1 }
 0x115   : > { %v1243_v2 = vadd.f32 %v2602_v62, %v3631_v12  ;;  %v2605_v3 = vadd.f32 %v2604_v1, %v2603_v63  ;;  %v2690_v5 = vadd.f32 %v2689_v4, %v2688_v0  ;;  %v2691_v6 = vpop.f32.mrb[14].mxu1 }
 0x116   : > { %v2692_v8 = vpop.f32.mrb[15].mxu1 }
 0x117   : > { %v1246_v7 = vadd.f32 %v2605_v3, %v3631_v12  ;;  %v3653_v9 = vadd.f32 %v2690_v5, %v1243_v2  ;;  %v2693_v10 = vadd.f32 %v2692_v8, %v2691_v6 }
 0x119   : > { %v2606_v11 = vpop.f32.mrb[16].mxu0  ;;  %v3655_v13 = vadd.f32 %v2693_v10, %v1246_v7 }
 0x11a   : > { %v2607_v14 = vpop.f32.mrb[17].mxu0 }
 0x11b   : > { %v2608_v15 = vadd.f32 %v2607_v14, %v2606_v11  ;;  %v2609_v16 = vpop.f32.mrb[18].mxu0  ;;  %v2694_v17 = vpop.f32.mrb[16].mxu1 }
 0x11c   : > { %v2610_v18 = vpop.f32.mrb[19].mxu0  ;;  %v2695_v21 = vpop.f32.mrb[17].mxu1 }
 0x11d   : > { %v1251_v19 = vadd.f32 %v2608_v15, %v3631_v12  ;;  %v2611_v20 = vadd.f32 %v2610_v18, %v2609_v16  ;;  %v2696_v22 = vadd.f32 %v2695_v21, %v2694_v17  ;;  %v2697_v23 = vpop.f32.mrb[18].mxu1 }
 0x11e   : > { %v2698_v26 = vpop.f32.mrb[19].mxu1 }
 0x11f   : > { %v1254_v24 = vadd.f32 %v2611_v20, %v3631_v12  ;;  %v3659_v27 = vadd.f32 %v2696_v22, %v1251_v19  ;;  %v2699_v29 = vadd.f32 %v2698_v26, %v2697_v23 }
 0x121   : > { %v2612_v30 = vpop.f32.mrb[20].mxu0  ;;  %v3661_v31 = vadd.f32 %v2699_v29, %v1254_v24 }
 0x122   : > { %v2613_v32 = vpop.f32.mrb[21].mxu0 }
 0x123   : > { %v2614_v33 = vadd.f32 %v2613_v32, %v2612_v30  ;;  %v2615_v34 = vpop.f32.mrb[22].mxu0  ;;  %v2700_v35 = vpop.f32.mrb[20].mxu1 }
 0x124   : > { %v2616_v36 = vpop.f32.mrb[23].mxu0  ;;  %v2701_v39 = vpop.f32.mrb[21].mxu1 }
 0x125   : > { %v1259_v37 = vadd.f32 %v2614_v33, %v3631_v12  ;;  %v2617_v38 = vadd.f32 %v2616_v36, %v2615_v34  ;;  %v2702_v40 = vadd.f32 %v2701_v39, %v2700_v35  ;;  %v2703_v42 = vpop.f32.mrb[22].mxu1 }
 0x126   : > { %v2704_v45 = vpop.f32.mrb[23].mxu1 }
 0x127   : > { %v1262_v43 = vadd.f32 %v2617_v38, %v3631_v12  ;;  %v3665_v46 = vadd.f32 %v2702_v40, %v1259_v37  ;;  %v2705_v47 = vadd.f32 %v2704_v45, %v2703_v42 }
 0x129   : > { %v2618_v48 = vpop.f32.mrb[24].mxu0  ;;  %v3667_v49 = vadd.f32 %v2705_v47, %v1262_v43 }
 0x12a   : > { %v2619_v50 = vpop.f32.mrb[25].mxu0 }
 0x12b   : > { %v2620_v51 = vadd.f32 %v2619_v50, %v2618_v48  ;;  %v2621_v52 = vpop.f32.mrb[26].mxu0  ;;  %v2706_v53 = vpop.f32.mrb[24].mxu1 }
 0x12c   : > { %v2622_v54 = vpop.f32.mrb[27].mxu0  ;;  %v2707_v58 = vpop.f32.mrb[25].mxu1 }
 0x12d   : > { %v1267_v55 = vadd.f32 %v2620_v51, %v3631_v12  ;;  %v2623_v56 = vadd.f32 %v2622_v54, %v2621_v52  ;;  %v2708_v59 = vadd.f32 %v2707_v58, %v2706_v53  ;;  %v2709_v61 = vpop.f32.mrb[26].mxu1 }
 0x12e   : > { %v2710_v63 = vpop.f32.mrb[27].mxu1 }
 0x12f   : > { %v1270_v62 = vadd.f32 %v2623_v56, %v3631_v12  ;;  %v3671_v0 = vadd.f32 %v2708_v59, %v1267_v55  ;;  %v2711_v1 = vadd.f32 %v2710_v63, %v2709_v61 }
 0x131   : > { %v2624_v2 = vpop.f32.mrb[28].mxu0  ;;  %v3673_v3 = vadd.f32 %v2711_v1, %v1270_v62 }
 0x132   : > { %v2625_v4 = vpop.f32.mrb[29].mxu0 }
 0x133   : > { %v2626_v5 = vadd.f32 %v2625_v4, %v2624_v2  ;;  %v2627_v6 = vpop.f32.mrb[30].mxu0  ;;  %v2712_v7 = vpop.f32.mrb[28].mxu1 }
 0x134   : > { %v2628_v8 = vpop.f32.mrb[31].mxu0  ;;  %v2713_v14 = vpop.f32.mrb[29].mxu1 }
 0x135   : > { %v1275_v10 = vadd.f32 %v2626_v5, %v3631_v12  ;;  %v2629_v11 = vadd.f32 %v2628_v8, %v2627_v6  ;;  %v2714_v15 = vadd.f32 %v2713_v14, %v2712_v7  ;;  %v2715_v16 = vpop.f32.mrb[30].mxu1 }
 0x136   : > { %v2716_v18 = vpop.f32.mrb[31].mxu1 }
 0x137   : > { %v1278_v17 = vadd.f32 %v2629_v11, %v3631_v12  ;;  %v3677_v19 = vadd.f32 %v2714_v15, %v1275_v10  ;;  %v2717_v20 = vadd.f32 %v2716_v18, %v2715_v16 }
 0x139   : > { %v2630_v21 = vpop.f32.mrb[32].mxu0  ;;  %v3679_v22 = vadd.f32 %v2717_v20, %v1278_v17 }
 0x13a   : > { %v2631_v23 = vpop.f32.mrb[33].mxu0 }
 0x13b   : > { %v2632_v24 = vadd.f32 %v2631_v23, %v2630_v21  ;;  %v2633_v26 = vpop.f32.mrb[34].mxu0  ;;  %v2718_v29 = vpop.f32.mrb[32].mxu1 }
 0x13c   : > { %v2634_v30 = vpop.f32.mrb[35].mxu0  ;;  %v2719_v34 = vpop.f32.mrb[33].mxu1 }
 0x13d   : > { %v1283_v32 = vadd.f32 %v2632_v24, %v3631_v12  ;;  %v2635_v33 = vadd.f32 %v2634_v30, %v2633_v26  ;;  %v2720_v35 = vadd.f32 %v2719_v34, %v2718_v29  ;;  %v2721_v36 = vpop.f32.mrb[34].mxu1 }
 0x13e   : > { %v2722_v38 = vpop.f32.mrb[35].mxu1 }
 0x13f   : > { %v1286_v37 = vadd.f32 %v2635_v33, %v3631_v12  ;;  %v3683_v39 = vadd.f32 %v2720_v35, %v1283_v32  ;;  %v2723_v40 = vadd.f32 %v2722_v38, %v2721_v36 }
 0x141   : > { %v2636_v42 = vpop.f32.mrb[36].mxu0  ;;  %v3685_v43 = vadd.f32 %v2723_v40, %v1286_v37 }
 0x142   : > { %v2637_v45 = vpop.f32.mrb[37].mxu0 }
 0x143   : > { %v2638_v47 = vadd.f32 %v2637_v45, %v2636_v42  ;;  %v2639_v48 = vpop.f32.mrb[38].mxu0  ;;  %v2724_v50 = vpop.f32.mrb[36].mxu1 }
 0x144   : > { %v2640_v51 = vpop.f32.mrb[39].mxu0  ;;  %v2725_v54 = vpop.f32.mrb[37].mxu1 }
 0x145   : > { %v1291_v52 = vadd.f32 %v2638_v47, %v3631_v12  ;;  %v2641_v53 = vadd.f32 %v2640_v51, %v2639_v48  ;;  %v2726_v55 = vadd.f32 %v2725_v54, %v2724_v50  ;;  %v2727_v56 = vpop.f32.mrb[38].mxu1 }
 0x146   : > { %v2728_v59 = vpop.f32.mrb[39].mxu1 }
 0x147   : > { %v1294_v58 = vadd.f32 %v2641_v53, %v3631_v12  ;;  %v3689_v61 = vadd.f32 %v2726_v55, %v1291_v52  ;;  %v2729_v62 = vadd.f32 %v2728_v59, %v2727_v56 }
 0x149   : > { %v2642_v63 = vpop.f32.mrb[40].mxu0  ;;  %v3691_v1 = vadd.f32 %v2729_v62, %v1294_v58 }
 0x14a   : > { %v2643_v2 = vpop.f32.mrb[41].mxu0 }
 0x14b   : > { %v2644_v4 = vadd.f32 %v2643_v2, %v2642_v63  ;;  %v2645_v5 = vpop.f32.mrb[42].mxu0  ;;  %v2730_v6 = vpop.f32.mrb[40].mxu1 }
 0x14c   : > { %v2646_v7 = vpop.f32.mrb[43].mxu0  ;;  %v2731_v11 = vpop.f32.mrb[41].mxu1 }
 0x14d   : > { %v1299_v8 = vadd.f32 %v2644_v4, %v3631_v12  ;;  %v2647_v10 = vadd.f32 %v2646_v7, %v2645_v5  ;;  %v2732_v14 = vadd.f32 %v2731_v11, %v2730_v6  ;;  %v2733_v15 = vpop.f32.mrb[42].mxu1 }
 0x14e   : > { %v2734_v17 = vpop.f32.mrb[43].mxu1 }
 0x14f   : > { %v1302_v16 = vadd.f32 %v2647_v10, %v3631_v12  ;;  %v3695_v18 = vadd.f32 %v2732_v14, %v1299_v8  ;;  %v2735_v20 = vadd.f32 %v2734_v17, %v2733_v15 }
 0x151   : > { %v2648_v21 = vpop.f32.mrb[44].mxu0  ;;  %v3697_v23 = vadd.f32 %v2735_v20, %v1302_v16 }
 0x152   : > { %v2649_v24 = vpop.f32.mrb[45].mxu0 }
 0x153   : > { %v2650_v26 = vadd.f32 %v2649_v24, %v2648_v21  ;;  %v2651_v29 = vpop.f32.mrb[46].mxu0  ;;  %v2736_v30 = vpop.f32.mrb[44].mxu1 }
 0x154   : > { %v2652_v32 = vpop.f32.mrb[47].mxu0  ;;  %v2737_v35 = vpop.f32.mrb[45].mxu1 }
 0x155   : > { %v1307_v33 = vadd.f32 %v2650_v26, %v3631_v12  ;;  %v2653_v34 = vadd.f32 %v2652_v32, %v2651_v29  ;;  %v2738_v36 = vadd.f32 %v2737_v35, %v2736_v30  ;;  %v2739_v37 = vpop.f32.mrb[46].mxu1 }
 0x156   : > { %v2740_v40 = vpop.f32.mrb[47].mxu1 }
 0x157   : > { %v1310_v38 = vadd.f32 %v2653_v34, %v3631_v12  ;;  %v3701_v42 = vadd.f32 %v2738_v36, %v1307_v33  ;;  %v2741_v45 = vadd.f32 %v2740_v40, %v2739_v37 }
 0x159   : > { %v2758_v47 = vpop.f32.mrb[48].mxu0  ;;  %v3703_v48 = vadd.f32 %v2741_v45, %v1310_v38 }
 0x15a   : > { %v2759_v50 = vpop.f32.mrb[49].mxu0 }
 0x15b   : > { %v2760_v51 = vadd.f32 %v2759_v50, %v2758_v47  ;;  %v2761_v52 = vpop.f32.mrb[50].mxu0  ;;  %v2875_v54 = vpop.f32.mrb[48].mxu1 }
 0x15c   : > { %v2762_v53 = vpop.f32.mrb[51].mxu0  ;;  %v1605_v58 = vpop.f32.mrb[49].mxu1 }
 0x15d   : > { %v2763_v55 = vadd.f32 %v2762_v53, %v2761_v52  ;;  %v1477_v56 = vadd.f32 %v2760_v51, %v3635_v25  ;;  %v2876_v59 = vpop.f32.mrb[50].mxu1 }
 0x15e   : > { %v1608_v63 = vpop.f32.mrb[51].mxu1 }
 0x15f   : > { %v1606_v62 = vadd.f32 %v1605_v58, %v1477_v56  ;;  %v1480_v12 = vadd.f32 %v2763_v55, %v3637_v28 }
 0x161   : > { %v2491_v2 = vmul.f32 -1.442695, %v1606_v62  ;;  %v1609_v4 = vadd.f32 %v1608_v63, %v1480_v12  ;;  %v2764_v5 = vpop.f32.mrb[52].mxu0 }
 0x162   : > { %v2765_v6 = vpop.f32.mrb[53].mxu0 }
 0x163   : > { %3127 = vpow2.f32 %v2491_v2  ;;  %v2492_v7 = vmul.f32 -1.442695, %v1609_v4  ;;  %v2766_v8 = vadd.f32 %v2765_v6, %v2764_v5  ;;  %v2767_v10 = vpop.f32.mrb[54].mxu0  ;;  %v2879_v14 = vpop.f32.mrb[52].mxu1 }
 0x164   : > { %v2768_v11 = vpop.f32.mrb[55].mxu0  ;;  %v1621_v16 = vpop.f32.mrb[53].mxu1 }
 0x165   : > { %3129 = vpow2.f32 %v2492_v7  ;;  %v1485_v15 = vadd.f32 %v2766_v8, %v3641_v41  ;;  %v2769_v25 = vadd.f32 %v2768_v11, %v2767_v10  ;;  %v2880_v17 = vpop.f32.mrb[54].mxu1 }
 0x166   : > { %v1624_v21 = vpop.f32.mrb[55].mxu1 }
 0x167   : > { %v1614_v20 = vadd.f32 %v2875_v54, %v1485_v15  ;;  %v1488_v28 = vadd.f32 %v2769_v25, %v3643_v44 }
 0x169   : > { %v2493_v24 = vmul.f32 -1.442695, %v1614_v20  ;;  %v1617_v26 = vadd.f32 %v2876_v59, %v1488_v28  ;;  %v2770_v29 = vpop.f32.mrb[56].mxu0 }
 0x16a   : > { %v2771_v30 = vpop.f32.mrb[57].mxu0 }
 0x16b   : > { %3131 = vpow2.f32 %v2493_v24  ;;  %v2494_v32 = vmul.f32 -1.442695, %v1617_v26  ;;  %v2772_v33 = vadd.f32 %v2771_v30, %v2770_v29  ;;  %v2773_v34 = vpop.f32.mrb[58].mxu0  ;;  %v3709_v36 = vpop.f32.mrb[56].mxu1 }
 0x16c   : > { %v2774_v35 = vpop.f32.mrb[59].mxu0  ;;  %v1637_v40 = vpop.f32.mrb[57].mxu1 }
 0x16d   : > { %v3128_v37 = vpop.eup %3127  ;;  %3133 = vpow2.f32 %v2494_v32  ;;  %v2775_v41 = vadd.f32 %v2774_v35, %v2773_v34  ;;  %v1493_v38 = vadd.f32 %v2772_v33, %v3647_v57  ;;  %v3712_v44 = vpop.f32.mrb[58].mxu1 }
 0x16e   : > { %v1772_v45 = vadd.f32 1.0, %v3128_v37  ;;  %v1640_v52 = vpop.f32.mrb[59].mxu1 }
 0x16f   : > { %v3130_v47 = vpop.eup %3129  ;;  %v1622_v50 = vadd.f32 %v1621_v16, %v1493_v38  ;;  %v1496_v51 = vadd.f32 %v2775_v41, %v3649_v60 }
 0x170   : > { %3135 = vrcp.f32 %v1772_v45  ;;  %v1773_v53 = vadd.f32 1.0, %v3130_v47 }
 0x171   : > { %v2495_v54 = vmul.f32 -1.442695, %v1622_v50  ;;  %v1625_v55 = vadd.f32 %v1624_v21, %v1496_v51  ;;  %v2776_v56 = vpop.f32.mrb[60].mxu0 }
 0x172   : > { %3137 = vrcp.f32 %v1773_v53  ;;  %v2777_v58 = vpop.f32.mrb[61].mxu0 }
 0x173   : > { %3139 = vpow2.f32 %v2495_v54  ;;  %v2496_v59 = vmul.f32 -1.442695, %v1625_v55  ;;  %v2778_v62 = vadd.f32 %v2777_v58, %v2776_v56  ;;  %v2779_v57 = vpop.f32.mrb[62].mxu0  ;;  %v3715_v63 = vpop.f32.mrb[60].mxu1 }
 0x174   : > { %v2780_v12 = vpop.f32.mrb[63].mxu0  ;;  %v3718_v5 = vpop.f32.mrb[61].mxu1 }
 0x175   : > { %v3132_v2 = vpop.eup %3131  ;;  %3141 = vpow2.f32 %v2496_v59  ;;  %v1501_v4 = vadd.f32 %v2778_v62, %v3653_v9  ;;  %v2781_v60 = vadd.f32 %v2780_v12, %v2779_v57  ;;  %v3720_v7 = vpop.f32.mrb[62].mxu1 }
 0x176   : > { %v1774_v6 = vadd.f32 1.0, %v3132_v2  ;;  %v3723_v15 = vpop.f32.mrb[63].mxu1 }
 0x177   : > { %v3134_v8 = vpop.eup %3133  ;;  %v1630_v10 = vadd.f32 %v2879_v14, %v1501_v4  ;;  %v1504_v11 = vadd.f32 %v2781_v60, %v3655_v13 }
 0x178   : > { %3143 = vrcp.f32 %v1774_v6  ;;  %v1775_v25 = vadd.f32 1.0, %v3134_v8 }
 0x179   : > { %v2497_v16 = vmul.f32 -1.442695, %v1630_v10  ;;  %v1633_v20 = vadd.f32 %v2880_v17, %v1504_v11  ;;  %v2782_v28 = vpop.f32.mrb[64].mxu0 }
 0x17a   : > { %v3136_v21 = vpop.eup %3135  ;;  %3145 = vrcp.f32 %v1775_v25  ;;  %v2783_v9 = vpop.f32.mrb[65].mxu0 }
 0x17b   : > { %3147 = vpow2.f32 %v2497_v16  ;;  %v2498_v24 = vmul.f32 -1.442695, %v1633_v20  ;;  %v2784_v26 = vadd.f32 %v2783_v9, %v2782_v28  ;;  %v2785_v29 = vpop.f32.mrb[66].mxu0  ;;  %2905 = vmatprep.mubr.msk.f32.mxu1 %vm1855_vm1, %v3136_v21  ;;  %v3726_v13 = vpop.f32.mrb[64].mxu1 }
 0x17c   : > { %v3138_v14 = vpop.eup %3137  ;;  %v2786_v30 = vpop.f32.mrb[67].mxu0 }
 0x17d   : > { %v3140_v32 = vpop.eup %3139  ;;  %3149 = vpow2.f32 %v2498_v24  ;;  %v2787_v33 = vadd.f32 %v2786_v30, %v2785_v29  ;;  %2906 = vmatmul.mubr.msk.f32.vlgmr.msra.gmra.mrb[72].mxu1 %vm1855_vm1, %v3138_v14  ;;  %v1509_v17 = vadd.f32 %v2784_v26, %v3659_v27  ;;  %v3730_v34 = vpop.f32.mrb[65].mxu1 }
 0x17e   : > { %v1776_v35 = vadd.f32 1.0, %v3140_v32  ;;  %v3732_v37 = vpop.f32.mrb[66].mxu1 }
 0x17f   : > { %v3142_v41 = vpop.eup %3141  ;;  %v1638_v38 = vadd.f32 %v1637_v40, %v1509_v17  ;;  %v1512_v45 = vadd.f32 %v2787_v33, %v3661_v31  ;;  %v3735_v47 = vpop.f32.mrb[67].mxu1 }
 0x180   : > { %3151 = vrcp.f32 %v1776_v35  ;;  %v1777_v50 = vadd.f32 1.0, %v3142_v41 }
 0x181   : > { %v2499_v51 = vmul.f32 -1.442695, %v1638_v38  ;;  %v1641_v53 = vadd.f32 %v1640_v52, %v1512_v45  ;;  %v2788_v54 = vpop.f32.mrb[68].mxu0 }
 0x182   : > { %v3144_v55 = vpop.eup %3143  ;;  %3153 = vrcp.f32 %v1777_v50  ;;  %v2789_v56 = vpop.f32.mrb[69].mxu0 }
 0x183   : > { %3155 = vpow2.f32 %v2499_v51  ;;  %v2500_v27 = vmul.f32 -1.442695, %v1641_v53  ;;  %v2790_v58 = vadd.f32 %v2789_v56, %v2788_v54  ;;  %v2791_v59 = vpop.f32.mrb[70].mxu0  ;;  %2908 = vmatprep.mubr.msk.f32.mxu1 %vm1855_vm1, %v3144_v55  ;;  %v3738_v57 = vpop.f32.mrb[68].mxu1 }
 0x184   : > { %v3146_v62 = vpop.eup %3145  ;;  %v2792_v40 = vpop.f32.mrb[71].mxu0 }
 0x185   : > { %v3148_v31 = vpop.eup %3147  ;;  %3157 = vpow2.f32 %v2500_v27  ;;  %v1517_v12 = vadd.f32 %v2790_v58, %v3665_v46  ;;  %v2793_v2 = vadd.f32 %v2792_v40, %v2791_v59  ;;  %2909 = vmatmul.mubr.msk.f32.gmra.mrb[74].mxu1 %vm1855_vm1, %v3146_v62  ;;  %v3742_v52 = vpop.f32.mrb[69].mxu1 }
 0x186   : > { %v1778_v4 = vadd.f32 1.0, %v3148_v31  ;;  %v3744_v60 = vpop.f32.mrb[70].mxu1 }
 0x187   : > { %v3150_v6 = vpop.eup %3149  ;;  %v1646_v8 = vadd.f32 %v3709_v36, %v1517_v12  ;;  %v1520_v10 = vadd.f32 %v2793_v2, %v3667_v49  ;;  %v3748_v11 = vpop.f32.mrb[71].mxu1 }
 0x188   : > { %3159 = vrcp.f32 %v1778_v4  ;;  %v1779_v25 = vadd.f32 1.0, %v3150_v6 }
 0x189   : > { %v2501_v16 = vmul.f32 -1.442695, %v1646_v8  ;;  %v1649_v46 = vadd.f32 %v3712_v44, %v1520_v10  ;;  %v2794_v20 = vpop.f32.mrb[72].mxu0 }
 0x18a   : > { %v3152_v28 = vpop.eup %3151  ;;  %3161 = vrcp.f32 %v1779_v25  ;;  %v2795_v21 = vpop.f32.mrb[73].mxu0 }
 0x18b   : > { %3163 = vpow2.f32 %v2501_v16  ;;  %v2502_v9 = vmul.f32 -1.442695, %v1649_v46  ;;  %v2796_v24 = vadd.f32 %v2795_v21, %v2794_v20  ;;  %v2797_v26 = vpop.f32.mrb[74].mxu0  ;;  %2911 = vmatprep.mubr.msk.f32.mxu1 %vm1855_vm1, %v3152_v28 }
 0x18c   : > { %v3154_v36 = vpop.eup %3153  ;;  %v2798_v29 = vpop.f32.mrb[75].mxu0 }
 0x18d   : > { %v3156_v49 = vpop.eup %3155  ;;  %3165 = vpow2.f32 %v2502_v9  ;;  %v2799_v14 = vadd.f32 %v2798_v29, %v2797_v26  ;;  %2912 = vmatmul.mubr.msk.f32.gmra.mrb[76].mxu1 %vm1855_vm1, %v3154_v36  ;;  %v1525_v30 = vadd.f32 %v2796_v24, %v3671_v0 }
 0x18e   : > { %v1780_v44 = vadd.f32 1.0, %v3156_v49 }
 0x18f   : > { %v3158_v32 = vpop.eup %3157  ;;  %v1654_v33 = vadd.f32 %v3718_v5, %v1525_v30  ;;  %v1528_v17 = vadd.f32 %v2799_v14, %v3673_v3 }
 0x190   : > { %3167 = vrcp.f32 %v1780_v44  ;;  %v1781_v35 = vadd.f32 1.0, %v3158_v32 }
 0x191   : > { %v2503_v41 = vmul.f32 -1.442695, %v1654_v33  ;;  %v1657_v38 = vadd.f32 %v3723_v15, %v1528_v17  ;;  %v2800_v45 = vpop.f32.mrb[76].mxu0 }
 0x192   : > { %v3160_v50 = vpop.eup %3159  ;;  %3169 = vrcp.f32 %v1781_v35  ;;  %v2801_v51 = vpop.f32.mrb[77].mxu0 }
 0x193   : > { %3171 = vpow2.f32 %v2503_v41  ;;  %v2504_v53 = vmul.f32 -1.442695, %v1657_v38  ;;  %v2802_v54 = vadd.f32 %v2801_v51, %v2800_v45  ;;  %v2803_v55 = vpop.f32.mrb[78].mxu0  ;;  %2914 = vmatprep.mubr.msk.f32.mxu1 %vm1855_vm1, %v3160_v50 }
 0x194   : > { %v3162_v0 = vpop.eup %3161  ;;  %v2804_v56 = vpop.f32.mrb[79].mxu0 }
 0x195   : > { %v3164_v5 = vpop.eup %3163  ;;  %3173 = vpow2.f32 %v2504_v53  ;;  %v1533_v3 = vadd.f32 %v2802_v54, %v3677_v19  ;;  %v2805_v27 = vadd.f32 %v2804_v56, %v2803_v55  ;;  %2915 = vmatmul.mubr.msk.f32.gmra.mrb[78].mxu1 %vm1855_vm1, %v3162_v0 }
 0x196   : > { %v1782_v15 = vadd.f32 1.0, %v3164_v5 }
 0x197   : > { %v3166_v58 = vpop.eup %3165  ;;  %v1662_v59 = vadd.f32 %v3715_v63, %v1533_v3  ;;  %v1536_v62 = vadd.f32 %v2805_v27, %v3679_v22 }
 0x198   : > { %3175 = vrcp.f32 %v1782_v15  ;;  %v1783_v40 = vadd.f32 1.0, %v3166_v58 }
 0x199   : > { %v2505_v31 = vmul.f32 -1.442695, %v1662_v59  ;;  %v1665_v12 = vadd.f32 %v3720_v7, %v1536_v62  ;;  %v2806_v2 = vpop.f32.mrb[80].mxu0 }
 0x19a   : > { %v3168_v4 = vpop.eup %3167  ;;  %3177 = vrcp.f32 %v1783_v40  ;;  %v2807_v6 = vpop.f32.mrb[81].mxu0 }
 0x19b   : > { %3179 = vpow2.f32 %v2505_v31  ;;  %v2506_v19 = vmul.f32 -1.442695, %v1665_v12  ;;  %v2808_v8 = vadd.f32 %v2807_v6, %v2806_v2  ;;  %v2809_v10 = vpop.f32.mrb[82].mxu0  ;;  %2917 = vmatprep.mubr.msk.f32.mxu1 %vm1855_vm1, %v3168_v4 }
 0x19c   : > { %v3170_v25 = vpop.eup %3169  ;;  %v2810_v16 = vpop.f32.mrb[83].mxu0 }
 0x19d   : > { %v3172_v63 = vpop.eup %3171  ;;  %3181 = vpow2.f32 %v2506_v19  ;;  %v2811_v22 = vadd.f32 %v2810_v16, %v2809_v10  ;;  %2918 = vmatmul.mubr.msk.f32.gmra.mrb[80].mxu1 %vm1855_vm1, %v3170_v25  ;;  %v1541_v46 = vadd.f32 %v2808_v8, %v3683_v39 }
 0x19e   : > { %v1784_v7 = vadd.f32 1.0, %v3172_v63 }
 0x19f   : > { %v3174_v20 = vpop.eup %3173  ;;  %v1670_v28 = vadd.f32 %v3730_v34, %v1541_v46  ;;  %v1544_v21 = vadd.f32 %v2811_v22, %v3685_v43 }
 0x1a0   : > { %3183 = vrcp.f32 %v1784_v7  ;;  %v1785_v9 = vadd.f32 1.0, %v3174_v20 }
 0x1a1   : > { %v2507_v24 = vmul.f32 -1.442695, %v1670_v28  ;;  %v1673_v26 = vadd.f32 %v3735_v47, %v1544_v21  ;;  %v2812_v36 = vpop.f32.mrb[84].mxu0 }
 0x1a2   : > { %v3176_v29 = vpop.eup %3175  ;;  %3185 = vrcp.f32 %v1785_v9  ;;  %v2813_v49 = vpop.f32.mrb[85].mxu0 }
 0x1a3   : > { %3187 = vpow2.f32 %v2507_v24  ;;  %v2508_v14 = vmul.f32 -1.442695, %v1673_v26  ;;  %v2814_v30 = vadd.f32 %v2813_v49, %v2812_v36  ;;  %v2815_v44 = vpop.f32.mrb[86].mxu0  ;;  %2920 = vmatprep.mubr.msk.f32.mxu1 %vm1855_vm1, %v3176_v29 }
 0x1a4   : > { %v3178_v39 = vpop.eup %3177  ;;  %v2816_v32 = vpop.f32.mrb[87].mxu0 }
 0x1a5   : > { %v3180_v34 = vpop.eup %3179  ;;  %3189 = vpow2.f32 %v2508_v14  ;;  %v1549_v43 = vadd.f32 %v2814_v30, %v3689_v61  ;;  %v2817_v33 = vadd.f32 %v2816_v32, %v2815_v44  ;;  %2921 = vmatmul.mubr.msk.f32.gmra.mrb[82].mxu1 %vm1855_vm1, %v3178_v39  ;;  %v3798_v32 = vld [vmem:[%s3885_s4] ss:$0 sm:$0xff] }
 0x1a6   : > { %v1786_v47 = vadd.f32 1.0, %v3180_v34 }
 0x1a7   : > { %v3182_v17 = vpop.eup %3181  ;;  %v1678_v35 = vadd.f32 %v3726_v13, %v1549_v43  ;;  %v1552_v41 = vadd.f32 %v2817_v33, %v3691_v1 }
 0x1a8   : > { %3191 = vrcp.f32 %v1786_v47  ;;  %v1787_v38 = vadd.f32 1.0, %v3182_v17 }
 0x1a9   : > { %v2509_v45 = vmul.f32 -1.442695, %v1678_v35  ;;  %v1681_v50 = vadd.f32 %v3732_v37, %v1552_v41  ;;  %v2818_v51 = vpop.f32.mrb[88].mxu0 }
 0x1aa   : > { %v3184_v53 = vpop.eup %3183  ;;  %3193 = vrcp.f32 %v1787_v38  ;;  %v2819_v54 = vpop.f32.mrb[89].mxu0 }
 0x1ab   : > { %3195 = vpow2.f32 %v2509_v45  ;;  %v2510_v61 = vmul.f32 -1.442695, %v1681_v50  ;;  %v2820_v55 = vadd.f32 %v2819_v54, %v2818_v51  ;;  %v2821_v0 = vpop.f32.mrb[90].mxu0  ;;  %2923 = vmatprep.mubr.msk.f32.mxu1 %vm1855_vm1, %v3184_v53 }
 0x1ac   : > { %v3186_v56 = vpop.eup %3185  ;;  %v2822_v5 = vpop.f32.mrb[91].mxu0 }
 0x1ad   : > { %v3188_v13 = vpop.eup %3187  ;;  %3197 = vpow2.f32 %v2510_v61  ;;  %v2823_v1 = vadd.f32 %v2822_v5, %v2821_v0  ;;  %2924 = vmatmul.mubr.msk.f32.gmra.mrb[84].mxu1 %vm1855_vm1, %v3186_v56  ;;  %v1557_v3 = vadd.f32 %v2820_v55, %v3695_v18 }
 0x1ae   : > { %v1788_v37 = vadd.f32 1.0, %v3188_v13 }
 0x1af   : > { %v3190_v27 = vpop.eup %3189  ;;  %v1686_v15 = vadd.f32 %v3742_v52, %v1557_v3  ;;  %v1560_v58 = vadd.f32 %v2823_v1, %v3697_v23 }
 0x1b0   : > { %3199 = vrcp.f32 %v1788_v37  ;;  %v1789_v59 = vadd.f32 1.0, %v3190_v27 }
 0x1b1   : > { %v2511_v62 = vmul.f32 -1.442695, %v1686_v15  ;;  %v1689_v40 = vadd.f32 %v3748_v11, %v1560_v58  ;;  %v2824_v31 = vpop.f32.mrb[92].mxu0 }
 0x1b2   : > { %v3192_v12 = vpop.eup %3191  ;;  %3201 = vrcp.f32 %v1789_v59  ;;  %v2825_v2 = vpop.f32.mrb[93].mxu0 }
 0x1b3   : > { %3203 = vpow2.f32 %v2511_v62  ;;  %v2512_v4 = vmul.f32 -1.442695, %v1689_v40  ;;  %v2826_v6 = vadd.f32 %v2825_v2, %v2824_v31  ;;  %v2827_v19 = vpop.f32.mrb[94].mxu0  ;;  %2926 = vmatprep.mubr.msk.f32.mxu1 %vm1855_vm1, %v3192_v12 }
 0x1b4   : > { %v3194_v18 = vpop.eup %3193  ;;  %v2828_v8 = vpop.f32.mrb[95].mxu0 }
 0x1b5   : > { %v3196_v52 = vpop.eup %3195  ;;  %3205 = vpow2.f32 %v2512_v4  ;;  %v1565_v23 = vadd.f32 %v2826_v6, %v3701_v42  ;;  %v2829_v10 = vadd.f32 %v2828_v8, %v2827_v19  ;;  %2927 = vmatmul.mubr.msk.f32.gmra.mrb[86].mxu1 %vm1855_vm1, %v3194_v18 }
 0x1b6   : > { %v1790_v11 = vadd.f32 1.0, %v3196_v52 }
 0x1b7   : > { %v3198_v25 = vpop.eup %3197  ;;  %v1694_v16 = vadd.f32 %v3738_v57, %v1565_v23  ;;  %v1568_v63 = vadd.f32 %v2829_v10, %v3703_v48 }
 0x1b8   : > { %3207 = vrcp.f32 %v1790_v11  ;;  %v1791_v22 = vadd.f32 1.0, %v3198_v25 }
 0x1b9   : > { %v2513_v46 = vmul.f32 -1.442695, %v1694_v16  ;;  %v1697_v7 = vadd.f32 %v3744_v60, %v1568_v63 }
 0x1ba   : > { %v3200_v20 = vpop.eup %3199  ;;  %3209 = vrcp.f32 %v1791_v22 }
 0x1bb   : > { %3211 = vpow2.f32 %v2513_v46  ;;  %v2514_v28 = vmul.f32 -1.442695, %v1697_v7  ;;  %2929 = vmatprep.mubr.msk.f32.mxu1 %vm1855_vm1, %v3200_v20 }
 0x1bc   : > { %v3202_v42 = vpop.eup %3201 }
 0x1bd   : > { %v3204_v21 = vpop.eup %3203  ;;  %3213 = vpow2.f32 %v2514_v28  ;;  %2930 = vmatmul.mubr.msk.f32.gmra.mrb[88].mxu1 %vm1855_vm1, %v3202_v42 }
 0x1be   : > { %v1792_v9 = vadd.f32 1.0, %v3204_v21 }
 0x1bf   : > { %v3206_v57 = vpop.eup %3205 }
 0x1c0   : > { %3215 = vrcp.f32 %v1792_v9  ;;  %v1793_v48 = vadd.f32 1.0, %v3206_v57 }
 0x1c2   : > { %v3208_v24 = vpop.eup %3207  ;;  %3217 = vrcp.f32 %v1793_v48 }
 0x1c3   : > { %2932 = vmatprep.mubr.msk.f32.mxu1 %vm1855_vm1, %v3208_v24 }
 0x1c4   : > { %v3210_v60 = vpop.eup %3209 }
 0x1c5   : > { %v3212_v26 = vpop.eup %3211  ;;  %2933 = vmatmul.mubr.msk.f32.gmra.mrb[90].mxu1 %vm1855_vm1, %v3210_v60 }
 0x1c6   : > { %v1794_v36 = vadd.f32 1.0, %v3212_v26 }
 0x1c7   : > { %v3214_v29 = vpop.eup %3213 }
 0x1c8   : > { %3219 = vrcp.f32 %v1794_v36  ;;  %v1795_v49 = vadd.f32 1.0, %v3214_v29 }
 0x1ca   : > { %v3216_v14 = vpop.eup %3215  ;;  %3221 = vrcp.f32 %v1795_v49 }
 0x1cb   : > { %2935 = vmatprep.mubr.msk.f32.mxu1 %vm1855_vm1, %v3216_v14 }
 0x1cc   : > { %v3218_v30 = vpop.eup %3217 }
 0x1cd   : > { %2936 = vmatmul.mubr.msk.f32.gmra.mrb[92].mxu1 %vm1855_vm1, %v3218_v30 }
 0x1d2   : > { %v3220_v44 = vpop.eup %3219 }
 0x1d3   : > { %2938 = vmatprep.mubr.msk.f32.mxu1 %vm1855_vm1, %v3220_v44 }
 0x1d4   : > { %v3222_v39 = vpop.eup %3221 }
 0x1d5   : > { %2939 = vmatmul.mubr.msk.f32.gmra.mrb[94].mxu1 %vm1855_vm1, %v3222_v39 }
 0x250   : > { %v2907_v34 = vpop.f32.mrb[72].mxu1 }
 0x251   : > { %v2000_v43 = vadd.f32 %v2907_v34, %v3798_v32  ;;  %v1994_v33 = vpop.f32.mrb[73].mxu1 }
 0x252   : > { %v1995_v47 = vadd.f32 %v3798_v32, %v1994_v33 }
 0x253   : > { %v2541_v17 = vmul.f32 -1.442695, %v2000_v43 }
 0x254   : > { %v2540_v35 = vmul.f32 -1.442695, %v1995_v47 }
 0x255   : > { %3223 = vpow2.f32 %v2541_v17 }
 0x256   : > { %3225 = vpow2.f32 %v2540_v35 }
 0x258   : > { %v2910_v41 = vpop.f32.mrb[74].mxu1 }
 0x259   : > { %v2010_v38 = vadd.f32 %v2910_v41, %v3798_v32  ;;  %v2004_v45 = vpop.f32.mrb[75].mxu1 }
 0x25a   : > { %v2005_v50 = vadd.f32 %v3798_v32, %v2004_v45 }
 0x25b   : > { %v2543_v51 = vmul.f32 -1.442695, %v2010_v38 }
 0x25c   : > { %v2542_v53 = vmul.f32 -1.442695, %v2005_v50 }
 0x25d   : > { %3227 = vpow2.f32 %v2543_v51 }
 0x25e   : > { %3229 = vpow2.f32 %v2542_v53 }
 0x25f   : > { %v3224_v54 = vpop.eup %3223 }
 0x260   : > { %v3226_v61 = vpop.eup %3225  ;;  %v2186_v55 = vadd.f32 1.0, %v3224_v54  ;;  %v2913_v0 = vpop.f32.mrb[76].mxu1 }
 0x261   : > { %v2185_v56 = vadd.f32 1.0, %v3226_v61  ;;  %v2020_v5 = vadd.f32 %v2913_v0, %v3798_v32  ;;  %v2014_v13 = vpop.f32.mrb[77].mxu1 }
 0x262   : > { %3231 = vrcp.f32 %v2186_v55  ;;  %v2015_v1 = vadd.f32 %v3798_v32, %v2014_v13 }
 0x263   : > { %3233 = vrcp.f32 %v2185_v56  ;;  %v2545_v3 = vmul.f32 -1.442695, %v2020_v5 }
 0x264   : > { %v2544_v37 = vmul.f32 -1.442695, %v2015_v1 }
 0x265   : > { %3235 = vpow2.f32 %v2545_v3 }
 0x266   : > { %3237 = vpow2.f32 %v2544_v37 }
 0x267   : > { %v3228_v27 = vpop.eup %3227 }
 0x268   : > { %v3230_v15 = vpop.eup %3229  ;;  %v2188_v58 = vadd.f32 1.0, %v3228_v27  ;;  %v2916_v59 = vpop.f32.mrb[78].mxu1 }
 0x269   : > { %v2187_v62 = vadd.f32 1.0, %v3230_v15  ;;  %v2030_v40 = vadd.f32 %v2916_v59, %v3798_v32  ;;  %v2024_v31 = vpop.f32.mrb[79].mxu1 }
 0x26a   : > { %3239 = vrcp.f32 %v2188_v58  ;;  %v2025_v12 = vadd.f32 %v3798_v32, %v2024_v31 }
 0x26b   : > { %3241 = vrcp.f32 %v2187_v62  ;;  %v2547_v2 = vmul.f32 -1.442695, %v2030_v40 }
 0x26c   : > { %v3232_v4 = vpop.eup %3231  ;;  %v2546_v6 = vmul.f32 -1.442695, %v2025_v12 }
 0x26d   : > { %v3234_v19 = vpop.eup %3233  ;;  %2259 = vst.msk [vmem:[%s3811_s24 + $0x8] sm:$0xff] %vm2257_vm2, %v3232_v4  ;;  %3243 = vpow2.f32 %v2547_v2 }
 0x26e   : > { %2258 = vst.msk [vmem:[%s3811_s24] sm:$0xff] %vm2257_vm2, %v3234_v19  ;;  %3245 = vpow2.f32 %v2546_v6 }
 0x26f   : > { %v3236_v18 = vpop.eup %3235 }
 0x270   : > { %v3238_v8 = vpop.eup %3237  ;;  %v2190_v52 = vadd.f32 1.0, %v3236_v18  ;;  %v2919_v23 = vpop.f32.mrb[80].mxu1 }
 0x271   : > { %v2189_v10 = vadd.f32 1.0, %v3238_v8  ;;  %v2040_v11 = vadd.f32 %v2919_v23, %v3798_v32  ;;  %v2034_v25 = vpop.f32.mrb[81].mxu1 }
 0x272   : > { %3247 = vrcp.f32 %v2190_v52  ;;  %v2035_v16 = vadd.f32 %v3798_v32, %v2034_v25 }
 0x273   : > { %3249 = vrcp.f32 %v2189_v10  ;;  %v2549_v63 = vmul.f32 -1.442695, %v2040_v11 }
 0x274   : > { %v3240_v22 = vpop.eup %3239  ;;  %v2548_v46 = vmul.f32 -1.442695, %v2035_v16 }
 0x275   : > { %v3242_v7 = vpop.eup %3241  ;;  %2261 = vst.msk [vmem:[%s3811_s24 + $0x18] sm:$0xff] %vm2257_vm2, %v3240_v22  ;;  %3251 = vpow2.f32 %v2549_v63 }
 0x276   : > { %2260 = vst.msk [vmem:[%s3811_s24 + $0x10] sm:$0xff] %vm2257_vm2, %v3242_v7  ;;  %3253 = vpow2.f32 %v2548_v46 }
 0x277   : > { %v3244_v20 = vpop.eup %3243 }
 0x278   : > { %v3246_v28 = vpop.eup %3245  ;;  %v2192_v42 = vadd.f32 1.0, %v3244_v20  ;;  %v2922_v21 = vpop.f32.mrb[82].mxu1 }
 0x279   : > { %v2191_v9 = vadd.f32 1.0, %v3246_v28  ;;  %v2050_v57 = vadd.f32 %v2922_v21, %v3798_v32  ;;  %v2044_v48 = vpop.f32.mrb[83].mxu1 }
 0x27a   : > { %3255 = vrcp.f32 %v2192_v42  ;;  %v2045_v24 = vadd.f32 %v3798_v32, %v2044_v48 }
 0x27b   : > { %3257 = vrcp.f32 %v2191_v9  ;;  %v2551_v60 = vmul.f32 -1.442695, %v2050_v57 }
 0x27c   : > { %v3248_v26 = vpop.eup %3247  ;;  %v2550_v36 = vmul.f32 -1.442695, %v2045_v24 }
 0x27d   : > { %v3250_v29 = vpop.eup %3249  ;;  %2263 = vst.msk [vmem:[%s3811_s24 + $0x28] sm:$0xff] %vm2257_vm2, %v3248_v26  ;;  %3259 = vpow2.f32 %v2551_v60 }
 0x27e   : > { %2262 = vst.msk [vmem:[%s3811_s24 + $0x20] sm:$0xff] %vm2257_vm2, %v3250_v29  ;;  %3261 = vpow2.f32 %v2550_v36 }
 0x27f   : > { %v3252_v49 = vpop.eup %3251 }
 0x280   : > { %v3254_v14 = vpop.eup %3253  ;;  %v2194_v30 = vadd.f32 1.0, %v3252_v49  ;;  %v2925_v44 = vpop.f32.mrb[84].mxu1 }
 0x281   : > { %v2193_v39 = vadd.f32 1.0, %v3254_v14  ;;  %v2060_v34 = vadd.f32 %v2925_v44, %v3798_v32  ;;  %v2054_v43 = vpop.f32.mrb[85].mxu1 }
 0x282   : > { %3263 = vrcp.f32 %v2194_v30  ;;  %v2055_v33 = vadd.f32 %v3798_v32, %v2054_v43 }
 0x283   : > { %3265 = vrcp.f32 %v2193_v39  ;;  %v2553_v47 = vmul.f32 -1.442695, %v2060_v34 }
 0x284   : > { %v3256_v17 = vpop.eup %3255  ;;  %v2552_v35 = vmul.f32 -1.442695, %v2055_v33 }
 0x285   : > { %v3258_v41 = vpop.eup %3257  ;;  %2265 = vst.msk [vmem:[%s3811_s24 + $0x38] sm:$0xff] %vm2257_vm2, %v3256_v17  ;;  %3267 = vpow2.f32 %v2553_v47 }
 0x286   : > { %2264 = vst.msk [vmem:[%s3811_s24 + $0x30] sm:$0xff] %vm2257_vm2, %v3258_v41  ;;  %3269 = vpow2.f32 %v2552_v35 }
 0x287   : > { %v3260_v38 = vpop.eup %3259 }
 0x288   : > { %v3262_v45 = vpop.eup %3261  ;;  %v2196_v50 = vadd.f32 1.0, %v3260_v38  ;;  %v2928_v51 = vpop.f32.mrb[86].mxu1 }
 0x289   : > { %v2195_v53 = vadd.f32 1.0, %v3262_v45  ;;  %v2070_v54 = vadd.f32 %v2928_v51, %v3798_v32  ;;  %v2064_v61 = vpop.f32.mrb[87].mxu1 }
 0x28a   : > { %3271 = vrcp.f32 %v2196_v50  ;;  %v2065_v55 = vadd.f32 %v3798_v32, %v2064_v61 }
 0x28b   : > { %3273 = vrcp.f32 %v2195_v53  ;;  %v2555_v0 = vmul.f32 -1.442695, %v2070_v54 }
 0x28c   : > { %v3264_v56 = vpop.eup %3263  ;;  %v2554_v5 = vmul.f32 -1.442695, %v2065_v55 }
 0x28d   : > { %v3266_v13 = vpop.eup %3265  ;;  %2267 = vst.msk [vmem:[%s3811_s24 + $0x48] sm:$0xff] %vm2257_vm2, %v3264_v56  ;;  %3275 = vpow2.f32 %v2555_v0 }
 0x28e   : > { %2266 = vst.msk [vmem:[%s3811_s24 + $0x40] sm:$0xff] %vm2257_vm2, %v3266_v13  ;;  %3277 = vpow2.f32 %v2554_v5 }
 0x28f   : > { %v3268_v1 = vpop.eup %3267 }
 0x290   : > { %v3270_v3 = vpop.eup %3269  ;;  %v2198_v37 = vadd.f32 1.0, %v3268_v1  ;;  %v2931_v27 = vpop.f32.mrb[88].mxu1 }
 0x291   : > { %v2197_v15 = vadd.f32 1.0, %v3270_v3  ;;  %v2080_v58 = vadd.f32 %v2931_v27, %v3798_v32  ;;  %v2074_v59 = vpop.f32.mrb[89].mxu1 }
 0x292   : > { %3279 = vrcp.f32 %v2198_v37  ;;  %v2075_v62 = vadd.f32 %v3798_v32, %v2074_v59 }
 0x293   : > { %3281 = vrcp.f32 %v2197_v15  ;;  %v2557_v40 = vmul.f32 -1.442695, %v2080_v58 }
 0x294   : > { %v3272_v31 = vpop.eup %3271  ;;  %v2556_v12 = vmul.f32 -1.442695, %v2075_v62 }
 0x295   : > { %v3274_v2 = vpop.eup %3273  ;;  %2269 = vst.msk [vmem:[%s3811_s24 + $0x58] sm:$0xff] %vm2257_vm2, %v3272_v31  ;;  %3283 = vpow2.f32 %v2557_v40 }
 0x296   : > { %2268 = vst.msk [vmem:[%s3811_s24 + $0x50] sm:$0xff] %vm2257_vm2, %v3274_v2  ;;  %3285 = vpow2.f32 %v2556_v12 }
 0x297   : > { %v3276_v4 = vpop.eup %3275 }
 0x298   : > { %v3278_v6 = vpop.eup %3277  ;;  %v2200_v19 = vadd.f32 1.0, %v3276_v4  ;;  %v2934_v18 = vpop.f32.mrb[90].mxu1 }
 0x299   : > { %v2199_v8 = vadd.f32 1.0, %v3278_v6  ;;  %v2090_v52 = vadd.f32 %v2934_v18, %v3798_v32  ;;  %v2084_v23 = vpop.f32.mrb[91].mxu1 }
 0x29a   : > { %3287 = vrcp.f32 %v2200_v19  ;;  %v2085_v10 = vadd.f32 %v3798_v32, %v2084_v23 }
 0x29b   : > { %3289 = vrcp.f32 %v2199_v8  ;;  %v2559_v11 = vmul.f32 -1.442695, %v2090_v52 }
 0x29c   : > { %v3280_v25 = vpop.eup %3279  ;;  %v2558_v16 = vmul.f32 -1.442695, %v2085_v10 }
 0x29d   : > { %v3282_v63 = vpop.eup %3281  ;;  %2271 = vst.msk [vmem:[%s3811_s24 + $0x68] sm:$0xff] %vm2257_vm2, %v3280_v25  ;;  %3291 = vpow2.f32 %v2559_v11 }
 0x29e   : > { %2270 = vst.msk [vmem:[%s3811_s24 + $0x60] sm:$0xff] %vm2257_vm2, %v3282_v63  ;;  %3293 = vpow2.f32 %v2558_v16 }
 0x29f   : > { %v3284_v22 = vpop.eup %3283 }
 0x2a0   : > { %v3286_v46 = vpop.eup %3285  ;;  %v2202_v7 = vadd.f32 1.0, %v3284_v22  ;;  %v2937_v20 = vpop.f32.mrb[92].mxu1 }
 0x2a1   : > { %v2201_v28 = vadd.f32 1.0, %v3286_v46  ;;  %v2100_v42 = vadd.f32 %v2937_v20, %v3798_v32  ;;  %v2094_v21 = vpop.f32.mrb[93].mxu1 }
 0x2a2   : > { %3295 = vrcp.f32 %v2202_v7  ;;  %v2095_v9 = vadd.f32 %v3798_v32, %v2094_v21 }
 0x2a3   : > { %3297 = vrcp.f32 %v2201_v28  ;;  %v2561_v57 = vmul.f32 -1.442695, %v2100_v42 }
 0x2a4   : > { %v3288_v48 = vpop.eup %3287  ;;  %v2560_v24 = vmul.f32 -1.442695, %v2095_v9 }
 0x2a5   : > { %v3290_v60 = vpop.eup %3289  ;;  %2273 = vst.msk [vmem:[%s3811_s24 + $0x78] sm:$0xff] %vm2257_vm2, %v3288_v48  ;;  %3299 = vpow2.f32 %v2561_v57 }
 0x2a6   : > { %2272 = vst.msk [vmem:[%s3811_s24 + $0x70] sm:$0xff] %vm2257_vm2, %v3290_v60  ;;  %3301 = vpow2.f32 %v2560_v24 }
 0x2a7   : > { %v3292_v26 = vpop.eup %3291 }
 0x2a8   : > { %v3294_v36 = vpop.eup %3293  ;;  %v2204_v29 = vadd.f32 1.0, %v3292_v26  ;;  %v2940_v49 = vpop.f32.mrb[94].mxu1 }
 0x2a9   : > { %v2203_v14 = vadd.f32 1.0, %v3294_v36  ;;  %v2110_v30 = vadd.f32 %v2940_v49, %v3798_v32  ;;  %v2104_v44 = vpop.f32.mrb[95].mxu1 }
 0x2aa   : > { %3303 = vrcp.f32 %v2204_v29  ;;  %v2105_v39 = vadd.f32 %v3798_v32, %v2104_v44 }
 0x2ab   : > { %3305 = vrcp.f32 %v2203_v14  ;;  %v2563_v34 = vmul.f32 -1.442695, %v2110_v30 }
 0x2ac   : > { %v3296_v43 = vpop.eup %3295  ;;  %v2562_v33 = vmul.f32 -1.442695, %v2105_v39 }
 0x2ad   : > { %v3298_v47 = vpop.eup %3297  ;;  %2275 = vst.msk [vmem:[%s3811_s24 + $0x88] sm:$0xff] %vm2257_vm2, %v3296_v43  ;;  %3307 = vpow2.f32 %v2563_v34 }
 0x2ae   : > { %2274 = vst.msk [vmem:[%s3811_s24 + $0x80] sm:$0xff] %vm2257_vm2, %v3298_v47  ;;  %3309 = vpow2.f32 %v2562_v33 }
 0x2af   : > { %v3300_v17 = vpop.eup %3299 }
 0x2b0   : > { %v3302_v35 = vpop.eup %3301  ;;  %v2206_v41 = vadd.f32 1.0, %v3300_v17 }
 0x2b1   : > { %v2205_v38 = vadd.f32 1.0, %v3302_v35 }
 0x2b2   : > { %3311 = vrcp.f32 %v2206_v41 }
 0x2b3   : > { %3313 = vrcp.f32 %v2205_v38 }
 0x2b4   : > { %v3304_v32 = vpop.eup %3303 }
 0x2b5   : > { %v3306_v45 = vpop.eup %3305  ;;  %2277 = vst.msk [vmem:[%s3811_s24 + $0x98] sm:$0xff] %vm2257_vm2, %v3304_v32 }
 0x2b6   : > { %2276 = vst.msk [vmem:[%s3811_s24 + $0x90] sm:$0xff] %vm2257_vm2, %v3306_v45 }
 0x2b7   : > { %v3308_v50 = vpop.eup %3307 }
 0x2b8   : > { %v3310_v51 = vpop.eup %3309  ;;  %v2208_v53 = vadd.f32 1.0, %v3308_v50 }
 0x2b9   : > { %v2207_v54 = vadd.f32 1.0, %v3310_v51 }
 0x2ba   : > { %3315 = vrcp.f32 %v2208_v53 }
 0x2bb   : > { %3317 = vrcp.f32 %v2207_v54 }
 0x2bc   : > { %v3312_v61 = vpop.eup %3311 }
 0x2bd   : > { %v3314_v55 = vpop.eup %3313  ;;  %2279 = vst.msk [vmem:[%s3811_s24 + $0xa8] sm:$0xff] %vm2257_vm2, %v3312_v61 }
 0x2be   : > { %2278 = vst.msk [vmem:[%s3811_s24 + $0xa0] sm:$0xff] %vm2257_vm2, %v3314_v55 }
 0x2c4   : > { %v3316_v0 = vpop.eup %3315 }
 0x2c5   : > { %v3318_v56 = vpop.eup %3317  ;;  %2281 = vst.msk [vmem:[%s3811_s24 + $0xb8] sm:$0xff] %vm2257_vm2, %v3316_v0 }
 0x2c6   : > { %2280 = vst.msk [vmem:[%s3811_s24 + $0xb0] sm:$0xff] %vm2257_vm2, %v3318_v56 }
 0x2c7 PF: > { %s15_s18 = sadd.s32 1, %s3325_s18  }
 0x2c8   : > { %p12_p4 = scmp.ge.s32.totalorder %s15_s18, 4  }
 0x2ca   :  { %14 = sbr.rel (!%p12_p4) target bundleno = 1 (0x1), region = 70 }

</bundles_post_ra>
